<compile_context>
chip_gen: v5e
topology: v5e:2x2
jax: 0.10.0
libtpu: 0.0.40
codegen_flags: <defaults>
</compile_context>

<pallas_src>
import functools

import jax
import jax.numpy as jnp
from jax.experimental import pallas as pl
from jax.experimental.pallas import tpu as pltpu

EPS = 1e-5


# ----------------------------- Pallas kernels ------------------------------

def _layernorm(z, g, b, eps):
    mu = jnp.mean(z, axis=-1, keepdims=True)
    c = z - mu
    var = jnp.mean(c * c, axis=-1, keepdims=True)
    return c * jax.lax.rsqrt(var + eps) * g + b


def _embed_kernel(x_ref, w_ref, b_ref, o_ref):
    # x_ref: [1, N, L] f32; w_ref: [L, D] bf16; b_ref: [1, D] f32
    x = x_ref[0].astype(jnp.bfloat16)
    y = jnp.dot(x, w_ref[...], preferred_element_type=jnp.float32) + b_ref[...]
    o_ref[0] = y.astype(o_ref.dtype)


def _encoder_layer_kernel(h_ref,
                          wq_ref, bq_ref, wk_ref, bk_ref, wv_ref, bv_ref,
                          wo_ref, bo_ref, ln1_g_ref, ln1_b_ref,
                          w1_ref, b1_ref, w2_ref, b2_ref,
                          ln2_g_ref, ln2_b_ref,
                          o_ref, *, n_heads, eps):
    """Whole encoder layer for one batch's [N, D] token tile, in VMEM."""
    h = h_ref[0]                                     # [N, D] f32
    hb = h.astype(jnp.bfloat16)

    # ---- multi-head self-attention (scale folded into wq/bq) ----
    attn = jnp.zeros_like(h)                         # [N, D] f32 accumulator
    for hd in range(n_heads):                        # static unroll, H small
        qh = jnp.dot(hb, wq_ref[hd], preferred_element_type=jnp.float32) + bq_ref[hd]
        kh = jnp.dot(hb, wk_ref[hd], preferred_element_type=jnp.float32) + bk_ref[hd]
        vh = jnp.dot(hb, wv_ref[hd], preferred_element_type=jnp.float32) + bv_ref[hd]
        s = jnp.dot(qh, kh.T, preferred_element_type=jnp.float32)     # [N, N]
        s = s - jnp.max(s, axis=-1, keepdims=True)
        p = jnp.exp(s)
        p = p * pl.reciprocal(jnp.sum(p, axis=-1, keepdims=True), approx=True)
        oh = jnp.dot(p, vh, preferred_element_type=jnp.float32)       # [N, dk]
        # fold the per-head output projection into the accumulation
        attn = attn + jnp.dot(oh.astype(jnp.bfloat16), wo_ref[hd],
                              preferred_element_type=jnp.float32)
    attn = attn + bo_ref[...]

    # ---- residual + LayerNorm 1 ----
    h1 = _layernorm(h + attn, ln1_g_ref[...], ln1_b_ref[...], eps)

    # ---- position-wise FFN (relu) ----
    ff = jnp.dot(h1.astype(jnp.bfloat16), w1_ref[...],
                 preferred_element_type=jnp.float32) + b1_ref[...]
    ff = jnp.maximum(ff, 0.0)
    ff2 = jnp.dot(ff.astype(jnp.bfloat16), w2_ref[...],
                  preferred_element_type=jnp.float32) + b2_ref[...]

    # ---- residual + LayerNorm 2 ----
    out = _layernorm(h1 + ff2, ln2_g_ref[...], ln2_b_ref[...], eps)
    o_ref[0] = out.astype(o_ref.dtype)


def _final_kernel(h_ref, g_ref, b_ref, pw_ref, pb_ref, o_ref, *, eps):
    # fused encoder-final LayerNorm + projector (d_model -> pred_len)
    hn = _layernorm(h_ref[0], g_ref[...], b_ref[...], eps)
    y = jnp.dot(hn.astype(jnp.bfloat16), pw_ref[...],
                preferred_element_type=jnp.float32) + pb_ref[...]
    o_ref[0] = y.astype(o_ref.dtype)


# ----------------------------- pallas_call wrappers -------------------------

def _rep_spec(shape):
    """BlockSpec for an array replicated across the batch grid."""
    zeros = (0,) * len(shape)
    return pl.BlockSpec(shape, lambda b: zeros)


def _compiler_params():
    return pltpu.CompilerParams(
        dimension_semantics=("parallel",),
        vmem_limit_bytes=32 * 1024 * 1024,
    )


def inverted_embedding(tokens, w_bf, b2):
    """tokens: [B, N, L] -> [B, N, D]."""
    B, N, L = tokens.shape
    D = w_bf.shape[1]
    return pl.pallas_call(
        _embed_kernel,
        out_shape=jax.ShapeDtypeStruct((B, N, D), jnp.float32),
        grid=(B,),
        in_specs=[pl.BlockSpec((1, N, L), lambda b: (b, 0, 0)),
                  _rep_spec((L, D)),
                  _rep_spec((1, D))],
        out_specs=pl.BlockSpec((1, N, D), lambda b: (b, 0, 0)),
        compiler_params=_compiler_params(),
    )(tokens, w_bf, b2)


def encoder_layer(h, lp):
    """h: [B, N, D] -> [B, N, D], one fused pallas_call."""
    B, N, D = h.shape
    H, _, dk = lp["wq_h"].shape
    F = lp["w1_bf"].shape[1]
    in_specs = [
        pl.BlockSpec((1, N, D), lambda b: (b, 0, 0)),
        _rep_spec((H, D, dk)), _rep_spec((H, 1, dk)),     # wq, bq
        _rep_spec((H, D, dk)), _rep_spec((H, 1, dk)),     # wk, bk
        _rep_spec((H, D, dk)), _rep_spec((H, 1, dk)),     # wv, bv
        _rep_spec((H, dk, D)), _rep_spec((1, D)),         # wo, bo
        _rep_spec((1, D)), _rep_spec((1, D)),             # ln1 g, b
        _rep_spec((D, F)), _rep_spec((1, F)),             # w1, b1
        _rep_spec((F, D)), _rep_spec((1, D)),             # w2, b2
        _rep_spec((1, D)), _rep_spec((1, D)),             # ln2 g, b
    ]
    return pl.pallas_call(
        functools.partial(_encoder_layer_kernel, n_heads=H, eps=EPS),
        out_shape=jax.ShapeDtypeStruct((B, N, D), jnp.float32),
        grid=(B,),
        in_specs=in_specs,
        out_specs=pl.BlockSpec((1, N, D), lambda b: (b, 0, 0)),
        compiler_params=_compiler_params(),
    )(h, lp["wq_h"], lp["bq_h"], lp["wk_h"], lp["bk_h"], lp["wv_h"], lp["bv_h"],
      lp["wo_h"], lp["bo2"], lp["ln1_g2"], lp["ln1_b2"],
      lp["w1_bf"], lp["b1_2"], lp["w2_bf"], lp["b2_2"],
      lp["ln2_g2"], lp["ln2_b2"])


def final_norm_project(h, g2, b2, pw_bf, pb2):
    """LayerNorm(d_model) + Linear(d_model -> pred_len), fused. -> [B, N, P]."""
    B, N, D = h.shape
    P = pw_bf.shape[1]
    return pl.pallas_call(
        functools.partial(_final_kernel, eps=EPS),
        out_shape=jax.ShapeDtypeStruct((B, N, P), jnp.float32),
        grid=(B,),
        in_specs=[pl.BlockSpec((1, N, D), lambda b: (b, 0, 0)),
                  _rep_spec((1, D)), _rep_spec((1, D)),
                  _rep_spec((D, P)), _rep_spec((1, P))],
        out_specs=pl.BlockSpec((1, N, P), lambda b: (b, 0, 0)),
        compiler_params=_compiler_params(),
    )(h, g2, b2, pw_bf, pb2)


# --------------------------- Parameter creation -----------------------------

def init_params(key, seq_len, pred_len, d_model, n_heads, d_ff, enc_layers):
    """PyTorch-like f32 parameters ([in, out] weight layout)."""
    def dense(k, fan_in, fan_out):
        kw, _ = jax.random.split(k)
        w = jax.random.normal(kw, (fan_in, fan_out), jnp.float32) * 0.02
        b = jnp.zeros((fan_out,), jnp.float32)
        return w, b

    keys = jax.random.split(key, 2 + enc_layers)
    params = {}
    params["embed_w"], params["embed_b"] = dense(keys[0], seq_len, d_model)
    params["proj_w"], params["proj_b"] = dense(keys[1], d_model, pred_len)
    params["norm_g"] = jnp.ones((d_model,), jnp.float32)
    params["norm_b"] = jnp.zeros((d_model,), jnp.float32)

    layers = []
    for li in range(enc_layers):
        lk = jax.random.split(keys[2 + li], 6)
        lp = {}
        lp["wq"], lp["bq"] = dense(lk[0], d_model, d_model)
        lp["wk"], lp["bk"] = dense(lk[1], d_model, d_model)
        lp["wv"], lp["bv"] = dense(lk[2], d_model, d_model)
        lp["wo"], lp["bo"] = dense(lk[3], d_model, d_model)
        lp["w1"], lp["b1"] = dense(lk[4], d_model, d_ff)
        lp["w2"], lp["b2"] = dense(lk[5], d_ff, d_model)
        lp["ln1_g"] = jnp.ones((d_model,), jnp.float32)
        lp["ln1_b"] = jnp.zeros((d_model,), jnp.float32)
        lp["ln2_g"] = jnp.ones((d_model,), jnp.float32)
        lp["ln2_b"] = jnp.zeros((d_model,), jnp.float32)
        layers.append(lp)
    params["layers"] = layers
    return params


def prepare_params(params, n_heads):
    """Kernel-friendly layouts: per-head weight splits, bf16 matmul operands,
    attention scale folded into wq/bq, 2-D biases / LN params."""
    D = params["embed_w"].shape[1]
    H = n_heads
    dk = D // H
    scale = 1.0 / (dk ** 0.5)   # FullAttention(scale=None) -> 1/sqrt(d_head)

    def split_w(w, s=1.0):      # [D, D] -> [H, D, dk]
        return jnp.transpose((w * s).reshape(D, H, dk), (1, 0, 2)).astype(jnp.bfloat16)

    def split_b(b, s=1.0):      # [D] -> [H, 1, dk]
        return (b * s).reshape(H, 1, dk).astype(jnp.float32)

    prepared = {
        "embed_w_bf": params["embed_w"].astype(jnp.bfloat16),
        "embed_b2": params["embed_b"].reshape(1, D),
        "norm_g2": params["norm_g"].reshape(1, D),
        "norm_b2": params["norm_b"].reshape(1, D),
        "proj_w_bf": params["proj_w"].astype(jnp.bfloat16),
        "proj_b2": params["proj_b"].reshape(1, -1),
    }

    layers = []
    for lp in params["layers"]:
        F = lp["w1"].shape[1]
        layers.append({
            "wq_h": split_w(lp["wq"], scale), "bq_h": split_b(lp["bq"], scale),
            "wk_h": split_w(lp["wk"]),        "bk_h": split_b(lp["bk"]),
            "wv_h": split_w(lp["wv"]),        "bv_h": split_b(lp["bv"]),
            "wo_h": lp["wo"].reshape(H, dk, D).astype(jnp.bfloat16),
            "bo2": lp["bo"].reshape(1, D),
            "ln1_g2": lp["ln1_g"].reshape(1, D),
            "ln1_b2": lp["ln1_b"].reshape(1, D),
            "w1_bf": lp["w1"].astype(jnp.bfloat16),
            "b1_2": lp["b1"].reshape(1, F),
            "w2_bf": lp["w2"].astype(jnp.bfloat16),
            "b2_2": lp["b2"].reshape(1, D),
            "ln2_g2": lp["ln2_g"].reshape(1, D),
            "ln2_b2": lp["ln2_b"].reshape(1, D),
        })
    prepared["layers"] = layers
    return prepared


# -------------------------------- Forward -----------------------------------

def itransformer_forward(prepared, x):
    """x: [B, L, N] -> (dec_out [B, pred_len, N], attention_weight=None)."""
    B, L, N = x.shape

    # InvertedEmbedding: x.permute(0, 2, 1) then Linear(seq_len -> d_model)
    tokens = jnp.transpose(x, (0, 2, 1))                         # [B, N, L]
    h = inverted_embedding(tokens, prepared["embed_w_bf"],
                           prepared["embed_b2"])                 # [B, N, D]

    # Encoder: fused attention + FFN block per layer, one pallas_call each
    for lp in prepared["layers"]:
        h = encoder_layer(h, lp)

    # Final LayerNorm + projector (fused), then transpose(2, 1)
    out = final_norm_project(h, prepared["norm_g2"], prepared["norm_b2"],
                             prepared["proj_w_bf"], prepared["proj_b2"])
    dec_out = jnp.transpose(out, (0, 2, 1))                      # [B, P, N]

    # TODO(synk): output_attention=False -> attention weights not materialized.
    return dec_out, None


# --------------------------------- Main --------------------------------------

if __name__ == "__main__":
    # Small, module-consistent config
    B, seq_len, pred_len = 2, 8, 4
    N_variates = 6
    d_model, n_heads, d_ff, enc_layers = 32, 4, 64, 2

    key = jax.random.PRNGKey(0)
    kx, kp = jax.random.split(key)
    x = jax.random.normal(kx, (B, seq_len, N_variates), jnp.float32)

    params = init_params(kp, seq_len, pred_len, d_model, n_heads, d_ff,
                         enc_layers)
    prepared = prepare_params(params, n_heads)

    fwd = jax.jit(itransformer_forward)
    dec_out, attn_w = fwd(prepared, x)
    dec_out = jax.block_until_ready(dec_out)

    assert dec_out.shape == (B, pred_len, N_variates), dec_out.shape
    assert bool(jnp.all(jnp.isfinite(dec_out)))
    print("KERNEL_OK")
</pallas_src>

<mosaic_0001>
module attributes {stable_mosaic.version = 11 : i64} {
  func.func @_final_kernel(%arg0: i32, %arg1: memref<1x6x32xf32, #tpu.memory_space<vmem>>, %arg2: memref<1x32xf32, #tpu.memory_space<vmem>>, %arg3: memref<1x32xf32, #tpu.memory_space<vmem>>, %arg4: memref<32x4xbf16, #tpu.memory_space<vmem>>, %arg5: memref<1x4xf32, #tpu.memory_space<vmem>>, %arg6: memref<1x6x4xf32, #tpu.memory_space<vmem>>) attributes {dimension_semantics = [#tpu.dimension_semantics<parallel>], iteration_bounds = array<i64: 2>, scalar_prefetch = 0 : i64, scratch_operands = 0 : i64, tpu.core_type = #tpu.core_type<tc>, window_params = [{transform_indices = @transform_0, window_bounds = array<i64: 1, 6, 32>}, {pipeline_mode = #tpu.pipeline_mode<synchronous>, transform_indices = @transform_1, window_bounds = array<i64: 1, 32>}, {pipeline_mode = #tpu.pipeline_mode<synchronous>, transform_indices = @transform_2, window_bounds = array<i64: 1, 32>}, {pipeline_mode = #tpu.pipeline_mode<synchronous>, transform_indices = @transform_3, window_bounds = array<i64: 32, 4>}, {pipeline_mode = #tpu.pipeline_mode<synchronous>, transform_indices = @transform_4, window_bounds = array<i64: 1, 4>}, {transform_indices = @transform_5, window_bounds = array<i64: 1, 6, 4>}]} {
    %c0 = arith.constant 0 : index
    %c0_0 = arith.constant 0 : index
    %c0_1 = arith.constant 0 : index
    %0 = vector.load %arg1[%c0, %c0_0, %c0_1] : memref<1x6x32xf32, #tpu.memory_space<vmem>>, vector<1x6x32xf32>
    %1 = vector.shape_cast %0 : vector<1x6x32xf32> to vector<6x32xf32>
    %c0_2 = arith.constant 0 : index
    %c0_3 = arith.constant 0 : index
    %2 = vector.load %arg2[%c0_2, %c0_3] : memref<1x32xf32, #tpu.memory_space<vmem>>, vector<1x32xf32>
    %c0_4 = arith.constant 0 : index
    %c0_5 = arith.constant 0 : index
    %3 = vector.load %arg3[%c0_4, %c0_5] : memref<1x32xf32, #tpu.memory_space<vmem>>, vector<1x32xf32>
    %cst = arith.constant dense<0.000000e+00> : vector<6xf32>
    %4 = vector.multi_reduction <add>, %1, %cst [1] : vector<6x32xf32> to vector<6xf32>
    %5 = vector.shape_cast %4 : vector<6xf32> to vector<6x1xf32>
    %cst_6 = arith.constant 3.200000e+01 : f32
    %6 = vector.broadcast %cst_6 : f32 to vector<6x1xf32>
    %7 = arith.divf %5, %6 : vector<6x1xf32>
    %8 = vector.broadcast %7 : vector<6x1xf32> to vector<6x32xf32>
    %9 = arith.subf %1, %8 : vector<6x32xf32>
    %10 = arith.mulf %9, %9 : vector<6x32xf32>
    %cst_7 = arith.constant dense<0.000000e+00> : vector<6xf32>
    %11 = vector.multi_reduction <add>, %10, %cst_7 [1] : vector<6x32xf32> to vector<6xf32>
    %12 = vector.shape_cast %11 : vector<6xf32> to vector<6x1xf32>
    %cst_8 = arith.constant 3.200000e+01 : f32
    %13 = vector.broadcast %cst_8 : f32 to vector<6x1xf32>
    %14 = arith.divf %12, %13 : vector<6x1xf32>
    %cst_9 = arith.constant 9.99999974E-6 : f32
    %15 = vector.broadcast %cst_9 : f32 to vector<6x1xf32>
    %16 = arith.addf %14, %15 : vector<6x1xf32>
    %17 = math.rsqrt %16 : vector<6x1xf32>
    %18 = vector.broadcast %17 : vector<6x1xf32> to vector<6x32xf32>
    %19 = arith.mulf %9, %18 : vector<6x32xf32>
    %20 = vector.broadcast %2 : vector<1x32xf32> to vector<6x32xf32>
    %21 = arith.mulf %19, %20 : vector<6x32xf32>
    %22 = vector.broadcast %3 : vector<1x32xf32> to vector<6x32xf32>
    %23 = arith.addf %21, %22 : vector<6x32xf32>
    %24 = arith.truncf %23 : vector<6x32xf32> to vector<6x32xbf16>
    %c0_10 = arith.constant 0 : index
    %c0_11 = arith.constant 0 : index
    %25 = vector.load %arg4[%c0_10, %c0_11] : memref<32x4xbf16, #tpu.memory_space<vmem>>, vector<32x4xbf16>
    %cst_12 = arith.constant dense<0.000000e+00> : vector<6x4xf32>
    %26 = tpu.matmul %24, %25, %cst_12 {dimension_numbers = #tpu.dot_dimension_numbers<[1], [0], [0], [1], [0, 0, 1, 1], [], []>} : vector<6x32xbf16>, vector<32x4xbf16>, vector<6x4xf32> -> vector<6x4xf32>
    %c0_13 = arith.constant 0 : index
    %c0_14 = arith.constant 0 : index
    %27 = vector.load %arg5[%c0_13, %c0_14] : memref<1x4xf32, #tpu.memory_space<vmem>>, vector<1x4xf32>
    %28 = vector.broadcast %27 : vector<1x4xf32> to vector<6x4xf32>
    %29 = arith.addf %26, %28 : vector<6x4xf32>
    %c0_15 = arith.constant 0 : index
    %c0_16 = arith.constant 0 : index
    %c0_17 = arith.constant 0 : index
    %30 = vector.load %arg6[%c0_15, %c0_16, %c0_17] : memref<1x6x4xf32, #tpu.memory_space<vmem>>, vector<1x6x4xf32>
    %31 = vector.shape_cast %30 : vector<1x6x4xf32> to vector<6x4xf32>
    %32 = vector.shape_cast %29 : vector<6x4xf32> to vector<1x6x4xf32>
    tpu.vector_store %arg6[%c0_15, %c0_16, %c0_17], %32 {strides = array<i32>} : memref<1x6x4xf32, #tpu.memory_space<vmem>>, vector<1x6x4xf32>,
    return
  }
  func.func @transform_0(%arg0: i32) -> (i32, i32, i32) {
    %c0_i32 = arith.constant 0 : i32
    %c0_i32_0 = arith.constant 0 : i32
    %c0_i32_1 = arith.constant 0 : i32
    return %arg0, %c0_i32, %c0_i32_0 : i32, i32, i32
  }
  func.func @transform_1(%arg0: i32) -> (i32, i32) {
    %c0_i32 = arith.constant 0 : i32
    %c0_i32_0 = arith.constant 0 : i32
    %c0_i32_1 = arith.constant 0 : i32
    return %c0_i32, %c0_i32_0 : i32, i32
  }
  func.func @transform_2(%arg0: i32) -> (i32, i32) {
    %c0_i32 = arith.constant 0 : i32
    %c0_i32_0 = arith.constant 0 : i32
    %c0_i32_1 = arith.constant 0 : i32
    return %c0_i32, %c0_i32_0 : i32, i32
  }
  func.func @transform_3(%arg0: i32) -> (i32, i32) {
    %c0_i32 = arith.constant 0 : i32
    %c0_i32_0 = arith.constant 0 : i32
    %c0_i32_1 = arith.constant 0 : i32
    return %c0_i32, %c0_i32_0 : i32, i32
  }
  func.func @transform_4(%arg0: i32) -> (i32, i32) {
    %c0_i32 = arith.constant 0 : i32
    %c0_i32_0 = arith.constant 0 : i32
    %c0_i32_1 = arith.constant 0 : i32
    return %c0_i32, %c0_i32_0 : i32, i32
  }
  func.func @transform_5(%arg0: i32) -> (i32, i32, i32) {
    %c0_i32 = arith.constant 0 : i32
    %c0_i32_0 = arith.constant 0 : i32
    %c0_i32_1 = arith.constant 0 : i32
    return %arg0, %c0_i32, %c0_i32_0 : i32, i32, i32
  }
}

module attributes {stable_mosaic.version = 11 : i64} {
  func.func @_embed_kernel(%arg0: i32, %arg1: memref<1x6x8xf32, #tpu.memory_space<vmem>>, %arg2: memref<8x32xbf16, #tpu.memory_space<vmem>>, %arg3: memref<1x32xf32, #tpu.memory_space<vmem>>, %arg4: memref<1x6x32xf32, #tpu.memory_space<vmem>>) attributes {dimension_semantics = [#tpu.dimension_semantics<parallel>], iteration_bounds = array<i64: 2>, scalar_prefetch = 0 : i64, scratch_operands = 0 : i64, tpu.core_type = #tpu.core_type<tc>, window_params = [{transform_indices = @transform_0, window_bounds = array<i64: 1, 6, 8>}, {pipeline_mode = #tpu.pipeline_mode<synchronous>, transform_indices = @transform_1, window_bounds = array<i64: 8, 32>}, {pipeline_mode = #tpu.pipeline_mode<synchronous>, transform_indices = @transform_2, window_bounds = array<i64: 1, 32>}, {transform_indices = @transform_3, window_bounds = array<i64: 1, 6, 32>}]} {
    %c0 = arith.constant 0 : index
    %c0_0 = arith.constant 0 : index
    %c0_1 = arith.constant 0 : index
    %0 = vector.load %arg1[%c0, %c0_0, %c0_1] : memref<1x6x8xf32, #tpu.memory_space<vmem>>, vector<1x6x8xf32>
    %1 = vector.shape_cast %0 : vector<1x6x8xf32> to vector<6x8xf32>
    %2 = arith.truncf %1 : vector<6x8xf32> to vector<6x8xbf16>
    %c0_2 = arith.constant 0 : index
    %c0_3 = arith.constant 0 : index
    %3 = vector.load %arg2[%c0_2, %c0_3] : memref<8x32xbf16, #tpu.memory_space<vmem>>, vector<8x32xbf16>
    %cst = arith.constant dense<0.000000e+00> : vector<6x32xf32>
    %4 = tpu.matmul %2, %3, %cst {dimension_numbers = #tpu.dot_dimension_numbers<[1], [0], [0], [1], [0, 0, 1, 1], [], []>} : vector<6x8xbf16>, vector<8x32xbf16>, vector<6x32xf32> -> vector<6x32xf32>
    %c0_4 = arith.constant 0 : index
    %c0_5 = arith.constant 0 : index
    %5 = vector.load %arg3[%c0_4, %c0_5] : memref<1x32xf32, #tpu.memory_space<vmem>>, vector<1x32xf32>
    %6 = vector.broadcast %5 : vector<1x32xf32> to vector<6x32xf32>
    %7 = arith.addf %4, %6 : vector<6x32xf32>
    %c0_6 = arith.constant 0 : index
    %c0_7 = arith.constant 0 : index
    %c0_8 = arith.constant 0 : index
    %8 = vector.load %arg4[%c0_6, %c0_7, %c0_8] : memref<1x6x32xf32, #tpu.memory_space<vmem>>, vector<1x6x32xf32>
    %9 = vector.shape_cast %8 : vector<1x6x32xf32> to vector<6x32xf32>
    %10 = vector.shape_cast %7 : vector<6x32xf32> to vector<1x6x32xf32>
    tpu.vector_store %arg4[%c0_6, %c0_7, %c0_8], %10 {strides = array<i32>} : memref<1x6x32xf32, #tpu.memory_space<vmem>>, vector<1x6x32xf32>,
    return
  }
  func.func @transform_0(%arg0: i32) -> (i32, i32, i32) {
    %c0_i32 = arith.constant 0 : i32
    %c0_i32_0 = arith.constant 0 : i32
    %c0_i32_1 = arith.constant 0 : i32
    return %arg0, %c0_i32, %c0_i32_0 : i32, i32, i32
  }
  func.func @transform_1(%arg0: i32) -> (i32, i32) {
    %c0_i32 = arith.constant 0 : i32
    %c0_i32_0 = arith.constant 0 : i32
    %c0_i32_1 = arith.constant 0 : i32
    return %c0_i32, %c0_i32_0 : i32, i32
  }
  func.func @transform_2(%arg0: i32) -> (i32, i32) {
    %c0_i32 = arith.constant 0 : i32
    %c0_i32_0 = arith.constant 0 : i32
    %c0_i32_1 = arith.constant 0 : i32
    return %c0_i32, %c0_i32_0 : i32, i32
  }
  func.func @transform_3(%arg0: i32) -> (i32, i32, i32) {
    %c0_i32 = arith.constant 0 : i32
    %c0_i32_0 = arith.constant 0 : i32
    %c0_i32_1 = arith.constant 0 : i32
    return %arg0, %c0_i32, %c0_i32_0 : i32, i32, i32
  }
}

module attributes {stable_mosaic.version = 11 : i64} {
  func.func @_encoder_layer_kernel(%arg0: i32, %arg1: memref<1x6x32xf32, #tpu.memory_space<vmem>>, %arg2: memref<4x32x8xbf16, #tpu.memory_space<vmem>>, %arg3: memref<4x1x8xf32, #tpu.memory_space<vmem>>, %arg4: memref<4x32x8xbf16, #tpu.memory_space<vmem>>, %arg5: memref<4x1x8xf32, #tpu.memory_space<vmem>>, %arg6: memref<4x32x8xbf16, #tpu.memory_space<vmem>>, %arg7: memref<4x1x8xf32, #tpu.memory_space<vmem>>, %arg8: memref<4x8x32xbf16, #tpu.memory_space<vmem>>, %arg9: memref<1x32xf32, #tpu.memory_space<vmem>>, %arg10: memref<1x32xf32, #tpu.memory_space<vmem>>, %arg11: memref<1x32xf32, #tpu.memory_space<vmem>>, %arg12: memref<32x64xbf16, #tpu.memory_space<vmem>>, %arg13: memref<1x64xf32, #tpu.memory_space<vmem>>, %arg14: memref<64x32xbf16, #tpu.memory_space<vmem>>, %arg15: memref<1x32xf32, #tpu.memory_space<vmem>>, %arg16: memref<1x32xf32, #tpu.memory_space<vmem>>, %arg17: memref<1x32xf32, #tpu.memory_space<vmem>>, %arg18: memref<1x6x32xf32, #tpu.memory_space<vmem>>) attributes {dimension_semantics = [#tpu.dimension_semantics<parallel>], iteration_bounds = array<i64: 2>, scalar_prefetch = 0 : i64, scratch_operands = 0 : i64, tpu.core_type = #tpu.core_type<tc>, window_params = [{transform_indices = @transform_0, window_bounds = array<i64: 1, 6, 32>}, {pipeline_mode = #tpu.pipeline_mode<synchronous>, transform_indices = @transform_1, window_bounds = array<i64: 4, 32, 8>}, {pipeline_mode = #tpu.pipeline_mode<synchronous>, transform_indices = @transform_2, window_bounds = array<i64: 4, 1, 8>}, {pipeline_mode = #tpu.pipeline_mode<synchronous>, transform_indices = @transform_3, window_bounds = array<i64: 4, 32, 8>}, {pipeline_mode = #tpu.pipeline_mode<synchronous>, transform_indices = @transform_4, window_bounds = array<i64: 4, 1, 8>}, {pipeline_mode = #tpu.pipeline_mode<synchronous>, transform_indices = @transform_5, window_bounds = array<i64: 4, 32, 8>}, {pipeline_mode = #tpu.pipeline_mode<synchronous>, transform_indices = @transform_6, window_bounds = array<i64: 4, 1, 8>}, {pipeline_mode = #tpu.pipeline_mode<synchronous>, transform_indices = @transform_7, window_bounds = array<i64: 4, 8, 32>}, {pipeline_mode = #tpu.pipeline_mode<synchronous>, transform_indices = @transform_8, window_bounds = array<i64: 1, 32>}, {pipeline_mode = #tpu.pipeline_mode<synchronous>, transform_indices = @transform_9, window_bounds = array<i64: 1, 32>}, {pipeline_mode = #tpu.pipeline_mode<synchronous>, transform_indices = @transform_10, window_bounds = array<i64: 1, 32>}, {pipeline_mode = #tpu.pipeline_mode<synchronous>, transform_indices = @transform_11, window_bounds = array<i64: 32, 64>}, {pipeline_mode = #tpu.pipeline_mode<synchronous>, transform_indices = @transform_12, window_bounds = array<i64: 1, 64>}, {pipeline_mode = #tpu.pipeline_mode<synchronous>, transform_indices = @transform_13, window_bounds = array<i64: 64, 32>}, {pipeline_mode = #tpu.pipeline_mode<synchronous>, transform_indices = @transform_14, window_bounds = array<i64: 1, 32>}, {pipeline_mode = #tpu.pipeline_mode<synchronous>, transform_indices = @transform_15, window_bounds = array<i64: 1, 32>}, {pipeline_mode = #tpu.pipeline_mode<synchronous>, transform_indices = @transform_16, window_bounds = array<i64: 1, 32>}, {transform_indices = @transform_17, window_bounds = array<i64: 1, 6, 32>}]} {
    %c0 = arith.constant 0 : index
    %c0_0 = arith.constant 0 : index
    %c0_1 = arith.constant 0 : index
    %0 = vector.load %arg1[%c0, %c0_0, %c0_1] : memref<1x6x32xf32, #tpu.memory_space<vmem>>, vector<1x6x32xf32>
    %1 = vector.shape_cast %0 : vector<1x6x32xf32> to vector<6x32xf32>
    %2 = arith.truncf %1 : vector<6x32xf32> to vector<6x32xbf16>
    %cst = arith.constant 0.000000e+00 : f32
    %3 = vector.broadcast %cst : f32 to vector<6x32xf32>
    %c0_2 = arith.constant 0 : index
    %c0_3 = arith.constant 0 : index
    %c0_4 = arith.constant 0 : index
    %4 = vector.load %arg2[%c0_2, %c0_3, %c0_4] : memref<4x32x8xbf16, #tpu.memory_space<vmem>>, vector<1x32x8xbf16>
    %5 = vector.shape_cast %4 : vector<1x32x8xbf16> to vector<32x8xbf16>
    %cst_5 = arith.constant dense<0.000000e+00> : vector<6x8xf32>
    %6 = tpu.matmul %2, %5, %cst_5 {dimension_numbers = #tpu.dot_dimension_numbers<[1], [0], [0], [1], [0, 0, 1, 1], [], []>} : vector<6x32xbf16>, vector<32x8xbf16>, vector<6x8xf32> -> vector<6x8xf32>
    %c0_6 = arith.constant 0 : index
    %c0_7 = arith.constant 0 : index
    %c0_8 = arith.constant 0 : index
    %7 = vector.load %arg3[%c0_6, %c0_7, %c0_8] : memref<4x1x8xf32, #tpu.memory_space<vmem>>, vector<1x1x8xf32>
    %8 = vector.shape_cast %7 : vector<1x1x8xf32> to vector<1x8xf32>
    %9 = vector.broadcast %8 : vector<1x8xf32> to vector<6x8xf32>
    %10 = arith.addf %6, %9 : vector<6x8xf32>
    %c0_9 = arith.constant 0 : index
    %c0_10 = arith.constant 0 : index
    %c0_11 = arith.constant 0 : index
    %11 = vector.load %arg4[%c0_9, %c0_10, %c0_11] : memref<4x32x8xbf16, #tpu.memory_space<vmem>>, vector<1x32x8xbf16>
    %12 = vector.shape_cast %11 : vector<1x32x8xbf16> to vector<32x8xbf16>
    %cst_12 = arith.constant dense<0.000000e+00> : vector<6x8xf32>
    %13 = tpu.matmul %2, %12, %cst_12 {dimension_numbers = #tpu.dot_dimension_numbers<[1], [0], [0], [1], [0, 0, 1, 1], [], []>} : vector<6x32xbf16>, vector<32x8xbf16>, vector<6x8xf32> -> vector<6x8xf32>
    %c0_13 = arith.constant 0 : index
    %c0_14 = arith.constant 0 : index
    %c0_15 = arith.constant 0 : index
    %14 = vector.load %arg5[%c0_13, %c0_14, %c0_15] : memref<4x1x8xf32, #tpu.memory_space<vmem>>, vector<1x1x8xf32>
    %15 = vector.shape_cast %14 : vector<1x1x8xf32> to vector<1x8xf32>
    %16 = vector.broadcast %15 : vector<1x8xf32> to vector<6x8xf32>
    %17 = arith.addf %13, %16 : vector<6x8xf32>
    %c0_16 = arith.constant 0 : index
    %c0_17 = arith.constant 0 : index
    %c0_18 = arith.constant 0 : index
    %18 = vector.load %arg6[%c0_16, %c0_17, %c0_18] : memref<4x32x8xbf16, #tpu.memory_space<vmem>>, vector<1x32x8xbf16>
    %19 = vector.shape_cast %18 : vector<1x32x8xbf16> to vector<32x8xbf16>
    %cst_19 = arith.constant dense<0.000000e+00> : vector<6x8xf32>
    %20 = tpu.matmul %2, %19, %cst_19 {dimension_numbers = #tpu.dot_dimension_numbers<[1], [0], [0], [1], [0, 0, 1, 1], [], []>} : vector<6x32xbf16>, vector<32x8xbf16>, vector<6x8xf32> -> vector<6x8xf32>
    %c0_20 = arith.constant 0 : index
    %c0_21 = arith.constant 0 : index
    %c0_22 = arith.constant 0 : index
    %21 = vector.load %arg7[%c0_20, %c0_21, %c0_22] : memref<4x1x8xf32, #tpu.memory_space<vmem>>, vector<1x1x8xf32>
    %22 = vector.shape_cast %21 : vector<1x1x8xf32> to vector<1x8xf32>
    %23 = vector.broadcast %22 : vector<1x8xf32> to vector<6x8xf32>
    %24 = arith.addf %20, %23 : vector<6x8xf32>
    %25 = tpu.transpose %17, [1, 0] : vector<6x8xf32> -> vector<8x6xf32>
    %cst_23 = arith.constant dense<0.000000e+00> : vector<6x6xf32>
    %26 = tpu.matmul %10, %25, %cst_23 {dimension_numbers = #tpu.dot_dimension_numbers<[1], [0], [0], [1], [0, 0, 1, 1], [], []>} : vector<6x8xf32>, vector<8x6xf32>, vector<6x6xf32> -> vector<6x6xf32>
    %cst_24 = arith.constant dense<0xFF800000> : vector<6xf32>
    %27 = vector.multi_reduction <maximumf>, %26, %cst_24 [1] : vector<6x6xf32> to vector<6xf32>
    %28 = vector.shape_cast %27 : vector<6xf32> to vector<6x1xf32>
    %29 = vector.broadcast %28 : vector<6x1xf32> to vector<6x6xf32>
    %30 = arith.subf %26, %29 : vector<6x6xf32>
    %31 = math.exp %30 : vector<6x6xf32>
    %cst_25 = arith.constant dense<0.000000e+00> : vector<6xf32>
    %32 = vector.multi_reduction <add>, %31, %cst_25 [1] : vector<6x6xf32> to vector<6xf32>
    %33 = vector.shape_cast %32 : vector<6xf32> to vector<6x1xf32>
    %34 = tpu.reciprocal %33 {approx = true} : vector<6x1xf32> -> vector<6x1xf32>
    %35 = vector.broadcast %34 : vector<6x1xf32> to vector<6x6xf32>
    %36 = arith.mulf %31, %35 : vector<6x6xf32>
    %cst_26 = arith.constant dense<0.000000e+00> : vector<6x8xf32>
    %37 = tpu.matmul %36, %24, %cst_26 {dimension_numbers = #tpu.dot_dimension_numbers<[1], [0], [0], [1], [0, 0, 1, 1], [], []>} : vector<6x6xf32>, vector<6x8xf32>, vector<6x8xf32> -> vector<6x8xf32>
    %38 = arith.truncf %37 : vector<6x8xf32> to vector<6x8xbf16>
    %c0_27 = arith.constant 0 : index
    %c0_28 = arith.constant 0 : index
    %c0_29 = arith.constant 0 : index
    %39 = vector.load %arg8[%c0_27, %c0_28, %c0_29] : memref<4x8x32xbf16, #tpu.memory_space<vmem>>, vector<1x8x32xbf16>
    %40 = vector.shape_cast %39 : vector<1x8x32xbf16> to vector<8x32xbf16>
    %cst_30 = arith.constant dense<0.000000e+00> : vector<6x32xf32>
    %41 = tpu.matmul %38, %40, %cst_30 {dimension_numbers = #tpu.dot_dimension_numbers<[1], [0], [0], [1], [0, 0, 1, 1], [], []>} : vector<6x8xbf16>, vector<8x32xbf16>, vector<6x32xf32> -> vector<6x32xf32>
    %42 = arith.addf %3, %41 : vector<6x32xf32>
    %c1 = arith.constant 1 : index
    %c0_31 = arith.constant 0 : index
    %c0_32 = arith.constant 0 : index
    %43 = vector.load %arg2[%c1, %c0_31, %c0_32] : memref<4x32x8xbf16, #tpu.memory_space<vmem>>, vector<1x32x8xbf16>
    %44 = vector.shape_cast %43 : vector<1x32x8xbf16> to vector<32x8xbf16>
    %cst_33 = arith.constant dense<0.000000e+00> : vector<6x8xf32>
    %45 = tpu.matmul %2, %44, %cst_33 {dimension_numbers = #tpu.dot_dimension_numbers<[1], [0], [0], [1], [0, 0, 1, 1], [], []>} : vector<6x32xbf16>, vector<32x8xbf16>, vector<6x8xf32> -> vector<6x8xf32>
    %c1_34 = arith.constant 1 : index
    %c0_35 = arith.constant 0 : index
    %c0_36 = arith.constant 0 : index
    %46 = vector.load %arg3[%c1_34, %c0_35, %c0_36] : memref<4x1x8xf32, #tpu.memory_space<vmem>>, vector<1x1x8xf32>
    %47 = vector.shape_cast %46 : vector<1x1x8xf32> to vector<1x8xf32>
    %48 = vector.broadcast %47 : vector<1x8xf32> to vector<6x8xf32>
    %49 = arith.addf %45, %48 : vector<6x8xf32>
    %c1_37 = arith.constant 1 : index
    %c0_38 = arith.constant 0 : index
    %c0_39 = arith.constant 0 : index
    %50 = vector.load %arg4[%c1_37, %c0_38, %c0_39] : memref<4x32x8xbf16, #tpu.memory_space<vmem>>, vector<1x32x8xbf16>
    %51 = vector.shape_cast %50 : vector<1x32x8xbf16> to vector<32x8xbf16>
    %cst_40 = arith.constant dense<0.000000e+00> : vector<6x8xf32>
    %52 = tpu.matmul %2, %51, %cst_40 {dimension_numbers = #tpu.dot_dimension_numbers<[1], [0], [0], [1], [0, 0, 1, 1], [], []>} : vector<6x32xbf16>, vector<32x8xbf16>, vector<6x8xf32> -> vector<6x8xf32>
    %c1_41 = arith.constant 1 : index
    %c0_42 = arith.constant 0 : index
    %c0_43 = arith.constant 0 : index
    %53 = vector.load %arg5[%c1_41, %c0_42, %c0_43] : memref<4x1x8xf32, #tpu.memory_space<vmem>>, vector<1x1x8xf32>
    %54 = vector.shape_cast %53 : vector<1x1x8xf32> to vector<1x8xf32>
    %55 = vector.broadcast %54 : vector<1x8xf32> to vector<6x8xf32>
    %56 = arith.addf %52, %55 : vector<6x8xf32>
    %c1_44 = arith.constant 1 : index
    %c0_45 = arith.constant 0 : index
    %c0_46 = arith.constant 0 : index
    %57 = vector.load %arg6[%c1_44, %c0_45, %c0_46] : memref<4x32x8xbf16, #tpu.memory_space<vmem>>, vector<1x32x8xbf16>
    %58 = vector.shape_cast %57 : vector<1x32x8xbf16> to vector<32x8xbf16>
    %cst_47 = arith.constant dense<0.000000e+00> : vector<6x8xf32>
    %59 = tpu.matmul %2, %58, %cst_47 {dimension_numbers = #tpu.dot_dimension_numbers<[1], [0], [0], [1], [0, 0, 1, 1], [], []>} : vector<6x32xbf16>, vector<32x8xbf16>, vector<6x8xf32> -> vector<6x8xf32>
    %c1_48 = arith.constant 1 : index
    %c0_49 = arith.constant 0 : index
    %c0_50 = arith.constant 0 : index
    %60 = vector.load %arg7[%c1_48, %c0_49, %c0_50] : memref<4x1x8xf32, #tpu.memory_space<vmem>>, vector<1x1x8xf32>
    %61 = vector.shape_cast %60 : vector<1x1x8xf32> to vector<1x8xf32>
    %62 = vector.broadcast %61 : vector<1x8xf32> to vector<6x8xf32>
    %63 = arith.addf %59, %62 : vector<6x8xf32>
    %64 = tpu.transpose %56, [1, 0] : vector<6x8xf32> -> vector<8x6xf32>
    %cst_51 = arith.constant dense<0.000000e+00> : vector<6x6xf32>
    %65 = tpu.matmul %49, %64, %cst_51 {dimension_numbers = #tpu.dot_dimension_numbers<[1], [0], [0], [1], [0, 0, 1, 1], [], []>} : vector<6x8xf32>, vector<8x6xf32>, vector<6x6xf32> -> vector<6x6xf32>
    %cst_52 = arith.constant dense<0xFF800000> : vector<6xf32>
    %66 = vector.multi_reduction <maximumf>, %65, %cst_52 [1] : vector<6x6xf32> to vector<6xf32>
    %67 = vector.shape_cast %66 : vector<6xf32> to vector<6x1xf32>
    %68 = vector.broadcast %67 : vector<6x1xf32> to vector<6x6xf32>
    %69 = arith.subf %65, %68 : vector<6x6xf32>
    %70 = math.exp %69 : vector<6x6xf32>
    %cst_53 = arith.constant dense<0.000000e+00> : vector<6xf32>
    %71 = vector.multi_reduction <add>, %70, %cst_53 [1] : vector<6x6xf32> to vector<6xf32>
    %72 = vector.shape_cast %71 : vector<6xf32> to vector<6x1xf32>
    %73 = tpu.reciprocal %72 {approx = true} : vector<6x1xf32> -> vector<6x1xf32>
    %74 = vector.broadcast %73 : vector<6x1xf32> to vector<6x6xf32>
    %75 = arith.mulf %70, %74 : vector<6x6xf32>
    %cst_54 = arith.constant dense<0.000000e+00> : vector<6x8xf32>
    %76 = tpu.matmul %75, %63, %cst_54 {dimension_numbers = #tpu.dot_dimension_numbers<[1], [0], [0], [1], [0, 0, 1, 1], [], []>} : vector<6x6xf32>, vector<6x8xf32>, vector<6x8xf32> -> vector<6x8xf32>
    %77 = arith.truncf %76 : vector<6x8xf32> to vector<6x8xbf16>
    %c1_55 = arith.constant 1 : index
    %c0_56 = arith.constant 0 : index
    %c0_57 = arith.constant 0 : index
    %78 = vector.load %arg8[%c1_55, %c0_56, %c0_57] : memref<4x8x32xbf16, #tpu.memory_space<vmem>>, vector<1x8x32xbf16>
    %79 = vector.shape_cast %78 : vector<1x8x32xbf16> to vector<8x32xbf16>
    %cst_58 = arith.constant dense<0.000000e+00> : vector<6x32xf32>
    %80 = tpu.matmul %77, %79, %cst_58 {dimension_numbers = #tpu.dot_dimension_numbers<[1], [0], [0], [1], [0, 0, 1, 1], [], []>} : vector<6x8xbf16>, vector<8x32xbf16>, vector<6x32xf32> -> vector<6x32xf32>
    %81 = arith.addf %42, %80 : vector<6x32xf32>
    %c2 = arith.constant 2 : index
    %c0_59 = arith.constant 0 : index
    %c0_60 = arith.constant 0 : index
    %82 = vector.load %arg2[%c2, %c0_59, %c0_60] : memref<4x32x8xbf16, #tpu.memory_space<vmem>>, vector<1x32x8xbf16>
    %83 = vector.shape_cast %82 : vector<1x32x8xbf16> to vector<32x8xbf16>
    %cst_61 = arith.constant dense<0.000000e+00> : vector<6x8xf32>
    %84 = tpu.matmul %2, %83, %cst_61 {dimension_numbers = #tpu.dot_dimension_numbers<[1], [0], [0], [1], [0, 0, 1, 1], [], []>} : vector<6x32xbf16>, vector<32x8xbf16>, vector<6x8xf32> -> vector<6x8xf32>
    %c2_62 = arith.constant 2 : index
    %c0_63 = arith.constant 0 : index
    %c0_64 = arith.constant 0 : index
    %85 = vector.load %arg3[%c2_62, %c0_63, %c0_64] : memref<4x1x8xf32, #tpu.memory_space<vmem>>, vector<1x1x8xf32>
    %86 = vector.shape_cast %85 : vector<1x1x8xf32> to vector<1x8xf32>
    %87 = vector.broadcast %86 : vector<1x8xf32> to vector<6x8xf32>
    %88 = arith.addf %84, %87 : vector<6x8xf32>
    %c2_65 = arith.constant 2 : index
    %c0_66 = arith.constant 0 : index
    %c0_67 = arith.constant 0 : index
    %89 = vector.load %arg4[%c2_65, %c0_66, %c0_67] : memref<4x32x8xbf16, #tpu.memory_space<vmem>>, vector<1x32x8xbf16>
    %90 = vector.shape_cast %89 : vector<1x32x8xbf16> to vector<32x8xbf16>
    %cst_68 = arith.constant dense<0.000000e+00> : vector<6x8xf32>
    %91 = tpu.matmul %2, %90, %cst_68 {dimension_numbers = #tpu.dot_dimension_numbers<[1], [0], [0], [1], [0, 0, 1, 1], [], []>} : vector<6x32xbf16>, vector<32x8xbf16>, vector<6x8xf32> -> vector<6x8xf32>
    %c2_69 = arith.constant 2 : index
    %c0_70 = arith.constant 0 : index
    %c0_71 = arith.constant 0 : index
    %92 = vector.load %arg5[%c2_69, %c0_70, %c0_71] : memref<4x1x8xf32, #tpu.memory_space<vmem>>, vector<1x1x8xf32>
    %93 = vector.shape_cast %92 : vector<1x1x8xf32> to vector<1x8xf32>
    %94 = vector.broadcast %93 : vector<1x8xf32> to vector<6x8xf32>
    %95 = arith.addf %91, %94 : vector<6x8xf32>
    %c2_72 = arith.constant 2 : index
    %c0_73 = arith.constant 0 : index
    %c0_74 = arith.constant 0 : index
    %96 = vector.load %arg6[%c2_72, %c0_73, %c0_74] : memref<4x32x8xbf16, #tpu.memory_space<vmem>>, vector<1x32x8xbf16>
    %97 = vector.shape_cast %96 : vector<1x32x8xbf16> to vector<32x8xbf16>
    %cst_75 = arith.constant dense<0.000000e+00> : vector<6x8xf32>
    %98 = tpu.matmul %2, %97, %cst_75 {dimension_numbers = #tpu.dot_dimension_numbers<[1], [0], [0], [1], [0, 0, 1, 1], [], []>} : vector<6x32xbf16>, vector<32x8xbf16>, vector<6x8xf32> -> vector<6x8xf32>
    %c2_76 = arith.constant 2 : index
    %c0_77 = arith.constant 0 : index
    %c0_78 = arith.constant 0 : index
    %99 = vector.load %arg7[%c2_76, %c0_77, %c0_78] : memref<4x1x8xf32, #tpu.memory_space<vmem>>, vector<1x1x8xf32>
    %100 = vector.shape_cast %99 : vector<1x1x8xf32> to vector<1x8xf32>
    %101 = vector.broadcast %100 : vector<1x8xf32> to vector<6x8xf32>
    %102 = arith.addf %98, %101 : vector<6x8xf32>
    %103 = tpu.transpose %95, [1, 0] : vector<6x8xf32> -> vector<8x6xf32>
    %cst_79 = arith.constant dense<0.000000e+00> : vector<6x6xf32>
    %104 = tpu.matmul %88, %103, %cst_79 {dimension_numbers = #tpu.dot_dimension_numbers<[1], [0], [0], [1], [0, 0, 1, 1], [], []>} : vector<6x8xf32>, vector<8x6xf32>, vector<6x6xf32> -> vector<6x6xf32>
    %cst_80 = arith.constant dense<0xFF800000> : vector<6xf32>
    %105 = vector.multi_reduction <maximumf>, %104, %cst_80 [1] : vector<6x6xf32> to vector<6xf32>
    %106 = vector.shape_cast %105 : vector<6xf32> to vector<6x1xf32>
    %107 = vector.broadcast %106 : vector<6x1xf32> to vector<6x6xf32>
    %108 = arith.subf %104, %107 : vector<6x6xf32>
    %109 = math.exp %108 : vector<6x6xf32>
    %cst_81 = arith.constant dense<0.000000e+00> : vector<6xf32>
    %110 = vector.multi_reduction <add>, %109, %cst_81 [1] : vector<6x6xf32> to vector<6xf32>
    %111 = vector.shape_cast %110 : vector<6xf32> to vector<6x1xf32>
    %112 = tpu.reciprocal %111 {approx = true} : vector<6x1xf32> -> vector<6x1xf32>
    %113 = vector.broadcast %112 : vector<6x1xf32> to vector<6x6xf32>
    %114 = arith.mulf %109, %113 : vector<6x6xf32>
    %cst_82 = arith.constant dense<0.000000e+00> : vector<6x8xf32>
    %115 = tpu.matmul %114, %102, %cst_82 {dimension_numbers = #tpu.dot_dimension_numbers<[1], [0], [0], [1], [0, 0, 1, 1], [], []>} : vector<6x6xf32>, vector<6x8xf32>, vector<6x8xf32> -> vector<6x8xf32>
    %116 = arith.truncf %115 : vector<6x8xf32> to vector<6x8xbf16>
    %c2_83 = arith.constant 2 : index
    %c0_84 = arith.constant 0 : index
    %c0_85 = arith.constant 0 : index
    %117 = vector.load %arg8[%c2_83, %c0_84, %c0_85] : memref<4x8x32xbf16, #tpu.memory_space<vmem>>, vector<1x8x32xbf16>
    %118 = vector.shape_cast %117 : vector<1x8x32xbf16> to vector<8x32xbf16>
    %cst_86 = arith.constant dense<0.000000e+00> : vector<6x32xf32>
    %119 = tpu.matmul %116, %118, %cst_86 {dimension_numbers = #tpu.dot_dimension_numbers<[1], [0], [0], [1], [0, 0, 1, 1], [], []>} : vector<6x8xbf16>, vector<8x32xbf16>, vector<6x32xf32> -> vector<6x32xf32>
    %120 = arith.addf %81, %119 : vector<6x32xf32>
    %c3 = arith.constant 3 : index
    %c0_87 = arith.constant 0 : index
    %c0_88 = arith.constant 0 : index
    %121 = vector.load %arg2[%c3, %c0_87, %c0_88] : memref<4x32x8xbf16, #tpu.memory_space<vmem>>, vector<1x32x8xbf16>
    %122 = vector.shape_cast %121 : vector<1x32x8xbf16> to vector<32x8xbf16>
    %cst_89 = arith.constant dense<0.000000e+00> : vector<6x8xf32>
    %123 = tpu.matmul %2, %122, %cst_89 {dimension_numbers = #tpu.dot_dimension_numbers<[1], [0], [0], [1], [0, 0, 1, 1], [], []>} : vector<6x32xbf16>, vector<32x8xbf16>, vector<6x8xf32> -> vector<6x8xf32>
    %c3_90 = arith.constant 3 : index
    %c0_91 = arith.constant 0 : index
    %c0_92 = arith.constant 0 : index
    %124 = vector.load %arg3[%c3_90, %c0_91, %c0_92] : memref<4x1x8xf32, #tpu.memory_space<vmem>>, vector<1x1x8xf32>
    %125 = vector.shape_cast %124 : vector<1x1x8xf32> to vector<1x8xf32>
    %126 = vector.broadcast %125 : vector<1x8xf32> to vector<6x8xf32>
    %127 = arith.addf %123, %126 : vector<6x8xf32>
    %c3_93 = arith.constant 3 : index
    %c0_94 = arith.constant 0 : index
    %c0_95 = arith.constant 0 : index
    %128 = vector.load %arg4[%c3_93, %c0_94, %c0_95] : memref<4x32x8xbf16, #tpu.memory_space<vmem>>, vector<1x32x8xbf16>
    %129 = vector.shape_cast %128 : vector<1x32x8xbf16> to vector<32x8xbf16>
    %cst_96 = arith.constant dense<0.000000e+00> : vector<6x8xf32>
    %130 = tpu.matmul %2, %129, %cst_96 {dimension_numbers = #tpu.dot_dimension_numbers<[1], [0], [0], [1], [0, 0, 1, 1], [], []>} : vector<6x32xbf16>, vector<32x8xbf16>, vector<6x8xf32> -> vector<6x8xf32>
    %c3_97 = arith.constant 3 : index
    %c0_98 = arith.constant 0 : index
    %c0_99 = arith.constant 0 : index
    %131 = vector.load %arg5[%c3_97, %c0_98, %c0_99] : memref<4x1x8xf32, #tpu.memory_space<vmem>>, vector<1x1x8xf32>
    %132 = vector.shape_cast %131 : vector<1x1x8xf32> to vector<1x8xf32>
    %133 = vector.broadcast %132 : vector<1x8xf32> to vector<6x8xf32>
    %134 = arith.addf %130, %133 : vector<6x8xf32>
    %c3_100 = arith.constant 3 : index
    %c0_101 = arith.constant 0 : index
    %c0_102 = arith.constant 0 : index
    %135 = vector.load %arg6[%c3_100, %c0_101, %c0_102] : memref<4x32x8xbf16, #tpu.memory_space<vmem>>, vector<1x32x8xbf16>
    %136 = vector.shape_cast %135 : vector<1x32x8xbf16> to vector<32x8xbf16>
    %cst_103 = arith.constant dense<0.000000e+00> : vector<6x8xf32>
    %137 = tpu.matmul %2, %136, %cst_103 {dimension_numbers = #tpu.dot_dimension_numbers<[1], [0], [0], [1], [0, 0, 1, 1], [], []>} : vector<6x32xbf16>, vector<32x8xbf16>, vector<6x8xf32> -> vector<6x8xf32>
    %c3_104 = arith.constant 3 : index
    %c0_105 = arith.constant 0 : index
    %c0_106 = arith.constant 0 : index
    %138 = vector.load %arg7[%c3_104, %c0_105, %c0_106] : memref<4x1x8xf32, #tpu.memory_space<vmem>>, vector<1x1x8xf32>
    %139 = vector.shape_cast %138 : vector<1x1x8xf32> to vector<1x8xf32>
    %140 = vector.broadcast %139 : vector<1x8xf32> to vector<6x8xf32>
    %141 = arith.addf %137, %140 : vector<6x8xf32>
    %142 = tpu.transpose %134, [1, 0] : vector<6x8xf32> -> vector<8x6xf32>
    %cst_107 = arith.constant dense<0.000000e+00> : vector<6x6xf32>
    %143 = tpu.matmul %127, %142, %cst_107 {dimension_numbers = #tpu.dot_dimension_numbers<[1], [0], [0], [1], [0, 0, 1, 1], [], []>} : vector<6x8xf32>, vector<8x6xf32>, vector<6x6xf32> -> vector<6x6xf32>
    %cst_108 = arith.constant dense<0xFF800000> : vector<6xf32>
    %144 = vector.multi_reduction <maximumf>, %143, %cst_108 [1] : vector<6x6xf32> to vector<6xf32>
    %145 = vector.shape_cast %144 : vector<6xf32> to vector<6x1xf32>
    %146 = vector.broadcast %145 : vector<6x1xf32> to vector<6x6xf32>
    %147 = arith.subf %143, %146 : vector<6x6xf32>
    %148 = math.exp %147 : vector<6x6xf32>
    %cst_109 = arith.constant dense<0.000000e+00> : vector<6xf32>
    %149 = vector.multi_reduction <add>, %148, %cst_109 [1] : vector<6x6xf32> to vector<6xf32>
    %150 = vector.shape_cast %149 : vector<6xf32> to vector<6x1xf32>
    %151 = tpu.reciprocal %150 {approx = true} : vector<6x1xf32> -> vector<6x1xf32>
    %152 = vector.broadcast %151 : vector<6x1xf32> to vector<6x6xf32>
    %153 = arith.mulf %148, %152 : vector<6x6xf32>
    %cst_110 = arith.constant dense<0.000000e+00> : vector<6x8xf32>
    %154 = tpu.matmul %153, %141, %cst_110 {dimension_numbers = #tpu.dot_dimension_numbers<[1], [0], [0], [1], [0, 0, 1, 1], [], []>} : vector<6x6xf32>, vector<6x8xf32>, vector<6x8xf32> -> vector<6x8xf32>
    %155 = arith.truncf %154 : vector<6x8xf32> to vector<6x8xbf16>
    %c3_111 = arith.constant 3 : index
    %c0_112 = arith.constant 0 : index
    %c0_113 = arith.constant 0 : index
    %156 = vector.load %arg8[%c3_111, %c0_112, %c0_113] : memref<4x8x32xbf16, #tpu.memory_space<vmem>>, vector<1x8x32xbf16>
    %157 = vector.shape_cast %156 : vector<1x8x32xbf16> to vector<8x32xbf16>
    %cst_114 = arith.constant dense<0.000000e+00> : vector<6x32xf32>
    %158 = tpu.matmul %155, %157, %cst_114 {dimension_numbers = #tpu.dot_dimension_numbers<[1], [0], [0], [1], [0, 0, 1, 1], [], []>} : vector<6x8xbf16>, vector<8x32xbf16>, vector<6x32xf32> -> vector<6x32xf32>
    %159 = arith.addf %120, %158 : vector<6x32xf32>
    %c0_115 = arith.constant 0 : index
    %c0_116 = arith.constant 0 : index
    %160 = vector.load %arg9[%c0_115, %c0_116] : memref<1x32xf32, #tpu.memory_space<vmem>>, vector<1x32xf32>
    %161 = vector.broadcast %160 : vector<1x32xf32> to vector<6x32xf32>
    %162 = arith.addf %159, %161 : vector<6x32xf32>
    %163 = arith.addf %1, %162 : vector<6x32xf32>
    %c0_117 = arith.constant 0 : index
    %c0_118 = arith.constant 0 : index
    %164 = vector.load %arg10[%c0_117, %c0_118] : memref<1x32xf32, #tpu.memory_space<vmem>>, vector<1x32xf32>
    %c0_119 = arith.constant 0 : index
    %c0_120 = arith.constant 0 : index
    %165 = vector.load %arg11[%c0_119, %c0_120] : memref<1x32xf32, #tpu.memory_space<vmem>>, vector<1x32xf32>
    %cst_121 = arith.constant dense<0.000000e+00> : vector<6xf32>
    %166 = vector.multi_reduction <add>, %163, %cst_121 [1] : vector<6x32xf32> to vector<6xf32>
    %167 = vector.shape_cast %166 : vector<6xf32> to vector<6x1xf32>
    %cst_122 = arith.constant 3.200000e+01 : f32
    %168 = vector.broadcast %cst_122 : f32 to vector<6x1xf32>
    %169 = arith.divf %167, %168 : vector<6x1xf32>
    %170 = vector.broadcast %169 : vector<6x1xf32> to vector<6x32xf32>
    %171 = arith.subf %163, %170 : vector<6x32xf32>
    %172 = arith.mulf %171, %171 : vector<6x32xf32>
    %cst_123 = arith.constant dense<0.000000e+00> : vector<6xf32>
    %173 = vector.multi_reduction <add>, %172, %cst_123 [1] : vector<6x32xf32> to vector<6xf32>
    %174 = vector.shape_cast %173 : vector<6xf32> to vector<6x1xf32>
    %cst_124 = arith.constant 3.200000e+01 : f32
    %175 = vector.broadcast %cst_124 : f32 to vector<6x1xf32>
    %176 = arith.divf %174, %175 : vector<6x1xf32>
    %cst_125 = arith.constant 9.99999974E-6 : f32
    %177 = vector.broadcast %cst_125 : f32 to vector<6x1xf32>
    %178 = arith.addf %176, %177 : vector<6x1xf32>
    %179 = math.rsqrt %178 : vector<6x1xf32>
    %180 = vector.broadcast %179 : vector<6x1xf32> to vector<6x32xf32>
    %181 = arith.mulf %171, %180 : vector<6x32xf32>
    %182 = vector.broadcast %164 : vector<1x32xf32> to vector<6x32xf32>
    %183 = arith.mulf %181, %182 : vector<6x32xf32>
    %184 = vector.broadcast %165 : vector<1x32xf32> to vector<6x32xf32>
    %185 = arith.addf %183, %184 : vector<6x32xf32>
    %186 = arith.truncf %185 : vector<6x32xf32> to vector<6x32xbf16>
    %c0_126 = arith.constant 0 : index
    %c0_127 = arith.constant 0 : index
    %187 = vector.load %arg12[%c0_126, %c0_127] : memref<32x64xbf16, #tpu.memory_space<vmem>>, vector<32x64xbf16>
    %cst_128 = arith.constant dense<0.000000e+00> : vector<6x64xf32>
    %188 = tpu.matmul %186, %187, %cst_128 {dimension_numbers = #tpu.dot_dimension_numbers<[1], [0], [0], [1], [0, 0, 1, 1], [], []>} : vector<6x32xbf16>, vector<32x64xbf16>, vector<6x64xf32> -> vector<6x64xf32>
    %c0_129 = arith.constant 0 : index
    %c0_130 = arith.constant 0 : index
    %189 = vector.load %arg13[%c0_129, %c0_130] : memref<1x64xf32, #tpu.memory_space<vmem>>, vector<1x64xf32>
    %190 = vector.broadcast %189 : vector<1x64xf32> to vector<6x64xf32>
    %191 = arith.addf %188, %190 : vector<6x64xf32>
    %cst_131 = arith.constant 0.000000e+00 : f32
    %192 = vector.broadcast %cst_131 : f32 to vector<6x64xf32>
    %193 = arith.maximumf %191, %192 : vector<6x64xf32>
    %194 = arith.truncf %193 : vector<6x64xf32> to vector<6x64xbf16>
    %c0_132 = arith.constant 0 : index
    %c0_133 = arith.constant 0 : index
    %195 = vector.load %arg14[%c0_132, %c0_133] : memref<64x32xbf16, #tpu.memory_space<vmem>>, vector<64x32xbf16>
    %cst_134 = arith.constant dense<0.000000e+00> : vector<6x32xf32>
    %196 = tpu.matmul %194, %195, %cst_134 {dimension_numbers = #tpu.dot_dimension_numbers<[1], [0], [0], [1], [0, 0, 1, 1], [], []>} : vector<6x64xbf16>, vector<64x32xbf16>, vector<6x32xf32> -> vector<6x32xf32>
    %c0_135 = arith.constant 0 : index
    %c0_136 = arith.constant 0 : index
    %197 = vector.load %arg15[%c0_135, %c0_136] : memref<1x32xf32, #tpu.memory_space<vmem>>, vector<1x32xf32>
    %198 = vector.broadcast %197 : vector<1x32xf32> to vector<6x32xf32>
    %199 = arith.addf %196, %198 : vector<6x32xf32>
    %200 = arith.addf %185, %199 : vector<6x32xf32>
    %c0_137 = arith.constant 0 : index
    %c0_138 = arith.constant 0 : index
    %201 = vector.load %arg16[%c0_137, %c0_138] : memref<1x32xf32, #tpu.memory_space<vmem>>, vector<1x32xf32>
    %c0_139 = arith.constant 0 : index
    %c0_140 = arith.constant 0 : index
    %202 = vector.load %arg17[%c0_139, %c0_140] : memref<1x32xf32, #tpu.memory_space<vmem>>, vector<1x32xf32>
    %cst_141 = arith.constant dense<0.000000e+00> : vector<6xf32>
    %203 = vector.multi_reduction <add>, %200, %cst_141 [1] : vector<6x32xf32> to vector<6xf32>
    %204 = vector.shape_cast %203 : vector<6xf32> to vector<6x1xf32>
    %cst_142 = arith.constant 3.200000e+01 : f32
    %205 = vector.broadcast %cst_142 : f32 to vector<6x1xf32>
    %206 = arith.divf %204, %205 : vector<6x1xf32>
    %207 = vector.broadcast %206 : vector<6x1xf32> to vector<6x32xf32>
    %208 = arith.subf %200, %207 : vector<6x32xf32>
    %209 = arith.mulf %208, %208 : vector<6x32xf32>
    %cst_143 = arith.constant dense<0.000000e+00> : vector<6xf32>
    %210 = vector.multi_reduction <add>, %209, %cst_143 [1] : vector<6x32xf32> to vector<6xf32>
    %211 = vector.shape_cast %210 : vector<6xf32> to vector<6x1xf32>
    %cst_144 = arith.constant 3.200000e+01 : f32
    %212 = vector.broadcast %cst_144 : f32 to vector<6x1xf32>
    %213 = arith.divf %211, %212 : vector<6x1xf32>
    %cst_145 = arith.constant 9.99999974E-6 : f32
    %214 = vector.broadcast %cst_145 : f32 to vector<6x1xf32>
    %215 = arith.addf %213, %214 : vector<6x1xf32>
    %216 = math.rsqrt %215 : vector<6x1xf32>
    %217 = vector.broadcast %216 : vector<6x1xf32> to vector<6x32xf32>
    %218 = arith.mulf %208, %217 : vector<6x32xf32>
    %219 = vector.broadcast %201 : vector<1x32xf32> to vector<6x32xf32>
    %220 = arith.mulf %218, %219 : vector<6x32xf32>
    %221 = vector.broadcast %202 : vector<1x32xf32> to vector<6x32xf32>
    %222 = arith.addf %220, %221 : vector<6x32xf32>
    %c0_146 = arith.constant 0 : index
    %c0_147 = arith.constant 0 : index
    %c0_148 = arith.constant 0 : index
    %223 = vector.load %arg18[%c0_146, %c0_147, %c0_148] : memref<1x6x32xf32, #tpu.memory_space<vmem>>, vector<1x6x32xf32>
    %224 = vector.shape_cast %223 : vector<1x6x32xf32> to vector<6x32xf32>
    %225 = vector.shape_cast %222 : vector<6x32xf32> to vector<1x6x32xf32>
    tpu.vector_store %arg18[%c0_146, %c0_147, %c0_148], %225 {strides = array<i32>} : memref<1x6x32xf32, #tpu.memory_space<vmem>>, vector<1x6x32xf32>,
    return
  }
  func.func @transform_0(%arg0: i32) -> (i32, i32, i32) {
    %c0_i32 = arith.constant 0 : i32
    %c0_i32_0 = arith.constant 0 : i32
    %c0_i32_1 = arith.constant 0 : i32
    return %arg0, %c0_i32, %c0_i32_0 : i32, i32, i32
  }
  func.func @transform_1(%arg0: i32) -> (i32, i32, i32) {
    %c0_i32 = arith.constant 0 : i32
    %c0_i32_0 = arith.constant 0 : i32
    %c0_i32_1 = arith.constant 0 : i32
    %c0_i32_2 = arith.constant 0 : i32
    return %c0_i32, %c0_i32_0, %c0_i32_1 : i32, i32, i32
  }
  func.func @transform_2(%arg0: i32) -> (i32, i32, i32) {
    %c0_i32 = arith.constant 0 : i32
    %c0_i32_0 = arith.constant 0 : i32
    %c0_i32_1 = arith.constant 0 : i32
    %c0_i32_2 = arith.constant 0 : i32
    return %c0_i32, %c0_i32_0, %c0_i32_1 : i32, i32, i32
  }
  func.func @transform_3(%arg0: i32) -> (i32, i32, i32) {
    %c0_i32 = arith.constant 0 : i32
    %c0_i32_0 = arith.constant 0 : i32
    %c0_i32_1 = arith.constant 0 : i32
    %c0_i32_2 = arith.constant 0 : i32
    return %c0_i32, %c0_i32_0, %c0_i32_1 : i32, i32, i32
  }
  func.func @transform_4(%arg0: i32) -> (i32, i32, i32) {
    %c0_i32 = arith.constant 0 : i32
    %c0_i32_0 = arith.constant 0 : i32
    %c0_i32_1 = arith.constant 0 : i32
    %c0_i32_2 = arith.constant 0 : i32
    return %c0_i32, %c0_i32_0, %c0_i32_1 : i32, i32, i32
  }
  func.func @transform_5(%arg0: i32) -> (i32, i32, i32) {
    %c0_i32 = arith.constant 0 : i32
    %c0_i32_0 = arith.constant 0 : i32
    %c0_i32_1 = arith.constant 0 : i32
    %c0_i32_2 = arith.constant 0 : i32
    return %c0_i32, %c0_i32_0, %c0_i32_1 : i32, i32, i32
  }
  func.func @transform_6(%arg0: i32) -> (i32, i32, i32) {
    %c0_i32 = arith.constant 0 : i32
    %c0_i32_0 = arith.constant 0 : i32
    %c0_i32_1 = arith.constant 0 : i32
    %c0_i32_2 = arith.constant 0 : i32
    return %c0_i32, %c0_i32_0, %c0_i32_1 : i32, i32, i32
  }
  func.func @transform_7(%arg0: i32) -> (i32, i32, i32) {
    %c0_i32 = arith.constant 0 : i32
    %c0_i32_0 = arith.constant 0 : i32
    %c0_i32_1 = arith.constant 0 : i32
    %c0_i32_2 = arith.constant 0 : i32
    return %c0_i32, %c0_i32_0, %c0_i32_1 : i32, i32, i32
  }
  func.func @transform_8(%arg0: i32) -> (i32, i32) {
    %c0_i32 = arith.constant 0 : i32
    %c0_i32_0 = arith.constant 0 : i32
    %c0_i32_1 = arith.constant 0 : i32
    return %c0_i32, %c0_i32_0 : i32, i32
  }
  func.func @transform_9(%arg0: i32) -> (i32, i32) {
    %c0_i32 = arith.constant 0 : i32
    %c0_i32_0 = arith.constant 0 : i32
    %c0_i32_1 = arith.constant 0 : i32
    return %c0_i32, %c0_i32_0 : i32, i32
  }
  func.func @transform_10(%arg0: i32) -> (i32, i32) {
    %c0_i32 = arith.constant 0 : i32
    %c0_i32_0 = arith.constant 0 : i32
    %c0_i32_1 = arith.constant 0 : i32
    return %c0_i32, %c0_i32_0 : i32, i32
  }
  func.func @transform_11(%arg0: i32) -> (i32, i32) {
    %c0_i32 = arith.constant 0 : i32
    %c0_i32_0 = arith.constant 0 : i32
    %c0_i32_1 = arith.constant 0 : i32
    return %c0_i32, %c0_i32_0 : i32, i32
  }
  func.func @transform_12(%arg0: i32) -> (i32, i32) {
    %c0_i32 = arith.constant 0 : i32
    %c0_i32_0 = arith.constant 0 : i32
    %c0_i32_1 = arith.constant 0 : i32
    return %c0_i32, %c0_i32_0 : i32, i32
  }
  func.func @transform_13(%arg0: i32) -> (i32, i32) {
    %c0_i32 = arith.constant 0 : i32
    %c0_i32_0 = arith.constant 0 : i32
    %c0_i32_1 = arith.constant 0 : i32
    return %c0_i32, %c0_i32_0 : i32, i32
  }
  func.func @transform_14(%arg0: i32) -> (i32, i32) {
    %c0_i32 = arith.constant 0 : i32
    %c0_i32_0 = arith.constant 0 : i32
    %c0_i32_1 = arith.constant 0 : i32
    return %c0_i32, %c0_i32_0 : i32, i32
  }
  func.func @transform_15(%arg0: i32) -> (i32, i32) {
    %c0_i32 = arith.constant 0 : i32
    %c0_i32_0 = arith.constant 0 : i32
    %c0_i32_1 = arith.constant 0 : i32
    return %c0_i32, %c0_i32_0 : i32, i32
  }
  func.func @transform_16(%arg0: i32) -> (i32, i32) {
    %c0_i32 = arith.constant 0 : i32
    %c0_i32_0 = arith.constant 0 : i32
    %c0_i32_1 = arith.constant 0 : i32
    return %c0_i32, %c0_i32_0 : i32, i32
  }
  func.func @transform_17(%arg0: i32) -> (i32, i32, i32) {
    %c0_i32 = arith.constant 0 : i32
    %c0_i32_0 = arith.constant 0 : i32
    %c0_i32_1 = arith.constant 0 : i32
    return %arg0, %c0_i32, %c0_i32_0 : i32, i32, i32
  }
}

</mosaic_0001>

<bundles_post_ra>
// kernel: itransformer_forward.7
= control target key start
LH: loop header
LB: loop body
LE: loop exit
PB: predicated region body
PF: predicated region fallthrough
CT: control target
= control target key end

     0   :  { %s430_s18 = smov 0   ;;  %s471_s0 = inlined_call_operand.vmem [shape: f32[2,6,32], index: 0, kind: input, shape index: {}]   ;;  %s472_s1 = inlined_call_operand.vmem [shape: f32[1,32], index: 1, kind: input, shape index: {}]   ;;  %s473_s2 = inlined_call_operand.vmem [shape: f32[1,32], index: 2, kind: input, shape index: {}]   ;;  %s474_s3 = inlined_call_operand.vmem [shape: bf16[32,4], index: 3, kind: input, shape index: {}]   ;;  %s475_s4 = inlined_call_operand.vmem [shape: f32[1,4], index: 4, kind: input, shape index: {}]   ;;  %s476_s5 = inlined_call_operand.vmem [shape: f32[2,6,4], index: 5, kind: output, shape index: {}]  }
   0x1 LB: > { %s355_s19 = sadd.s32 4294967295, %s397_s18   ;;  %p359_p0 = scmp.ge.s32.totalorder %s397_s18, 1  ;;  %s397_s18 = sphi %s430_s18, %s15_s18  }
   0x2   : > { %p186_p1 = scmp.lt.s32.totalorder %s397_s18, 3 }
   0x4   : > { %p187_p2 = pnand %p359_p0, %p186_p1 }
   0x5   : > { %p212_p3 = scmp.lt.s32.totalorder (!%p187_p2), %s355_s19, 1 }
   0x6   : > { %190 = sbr.rel (%p187_p2) target bundleno = 419 (0x1a3), region = 40 }
   0xb   : > { %s478_s19 = smov (!%p212_p3, %s355_s19), 1  ;;  %vm224_vm0 = vcmask 259072   ;;  %v399_v2 = vmov 32.0   ;;  %v374_v14 = vld [vmem:[%s474_s3 + $0x8] sm:$0xff]  ;;  %v373_v15 = vld [vmem:[%s474_s3] sm:$0xff]  ;;  %vm283_vm5 = vcmask 261120  }
   0xc   : > { %s360_s20 = sshll.u32 %s478_s19, 3  ;;  %387 = vrcp.f32 %v399_v2  ;;  %293 = vmatpush.bf16.msra.mxu0 %v374_v14  ;;  %v384_v25 = vld [vmem:[%s472_s1] ss:$0 sm:$0xff]  ;;  %vm300_vm6 = vcmask 29696  }
   0xd   : > { %s215_s23 = scalar_lea.vmem %s471_s0, %s360_s20  ;;  %v385_v28 = vld [vmem:[%s473_s2] ss:$0 sm:$0xff]  ;;  %s219_s11 = scalar_lea.vmem %s476_s5, %s360_s20 }
   0xe   : > { %v221_v0 = vld [vmem:[%s215_s23] sm:$0x3f] }
   0xf   : > { %v225_v1 = vsel %vm224_vm0, %v221_v0, 0.0  ;;  %v386_v32 = vld [vmem:[%s475_s4] ss:$0 sm:$0xff] }
  0x10   : > { %226 = vadd.xlane.f32.xlu0 %v225_v1  ;;  %294 = vmatpush.bf16.msra.mxu0 %v373_v15 }
  0x12   : > { %v388_v3 = vpop.eup %387 }
  0x13   : > { %v229_v4 = vmul.f32 32.0, %v388_v3  ;;  %vm233_vm1 = vweird.f32 %v388_v3 }
  0x15   : > { %v230_v5 = vsub.f32 1.0, %v229_v4 }
  0x17   : > { %v231_v6 = vmul.f32 %v388_v3, %v230_v5 }
  0x19   : > { %v232_v7 = vadd.f32 %v388_v3, %v231_v6 }
  0x1b   : > { %v234_v8 = vsel %vm233_vm1, %v388_v3, %v232_v7 }
  0x83   : > { %v227_v9 = vpop.xlane.xlu0 %226 }
  0x84   : > { %v235_v10 = vmul.f32 %v234_v8, %v227_v9 }
  0x86   : > { %v236_v11 = vsub.f32 %v221_v0, %v235_v10 }
  0x88   : > { %v237_v12 = vmul.f32 %v236_v11, %v236_v11 }
  0x8a   : > { %v238_v13 = vsel %vm224_vm0, %v237_v12, 0.0 }
  0x8b   : > { %239 = vadd.xlane.f32.xlu0 %v238_v13 }
  0xfe   : > { %v240_v16 = vpop.xlane.xlu0 %239 }
  0xff   : > { %v241_v17 = vmul.f32 %v240_v16, %v234_v8 }
 0x101   : > { %v242_v18 = vadd.f32 1e-05, %v241_v17 }
 0x103   : > { %389 = vrsqrt.f32 %v242_v18  ;;  %vm249_vm3 = vweird.f32 %v242_v18 }
 0x109   : > { %v390_v19 = vpop.eup %389 }
 0x10a   : > { %v244_v20 = vmul.f32 %v390_v19, %v242_v18  ;;  %vm250_vm2 = vweird.f32 %v390_v19 }
 0x10b   : > { %vm251_vm4 = vmor %vm249_vm3, %vm250_vm2 }
 0x10c   : > { %v245_v21 = vmul.f32 %v390_v19, %v244_v20 }
 0x10e   : > { %v246_v22 = vmul.f32 0.5, %v245_v21 }
 0x110   : > { %v247_v23 = vsub.f32 1.5, %v246_v22 }
 0x112   : > { %v248_v24 = vmul.f32 %v390_v19, %v247_v23 }
 0x114   : > { %v252_v26 = vsel %vm251_vm4, %v390_v19, %v248_v24 }
 0x115   : > { %v253_v27 = vmul.f32 %v252_v26, %v236_v11 }
 0x117   : > { %v257_v29 = vmul.f32 %v384_v25, %v253_v27 }
 0x119   : > { %v261_v30 = vadd.f32 %v385_v28, %v257_v29 }
 0x11b   : > { %v262_v31 = vpack.c.bf16 %v261_v30, %v261_v30 }
 0x11d   : > { %370 = vmatmul.msk.bf16.vlgmr.msra.gmra.mxu0 %vm283_vm5, %v262_v31 }
 0x19a   : > { %v296_v33 = vpop.f32.mrf.mxu0 }
 0x19b   : > { %v297_v34 = vadd.f32 %v386_v32, %v296_v33 }
 0x19d   : > { %301 = vst.msk [vmem:[%s219_s11] sm:$0x3f] %vm300_vm6, %v297_v34 }
 0x1a2   : > { %v298_v35 = vpop.f32.mrf.mxu0 }
 0x1a3 PF: > { %s15_s18 = sadd.s32 1, %s397_s18  }
 0x1a4   : > { %p12_p4 = scmp.ge.s32.totalorder %s15_s18, 4  }
 0x1a6   :  { %14 = sbr.rel (!%p12_p4) target bundleno = 1 (0x1), region = 70 }

// kernel: itransformer_forward.4
= control target key start
LH: loop header
LB: loop body
LE: loop exit
PB: predicated region body
PF: predicated region fallthrough
CT: control target
= control target key end

     0   :  { %s297_s12 = smov 0   ;;  %s314_s0 = inlined_call_operand.vmem [shape: f32[2,6,8], index: 0, kind: input, shape index: {}]   ;;  %s315_s1 = inlined_call_operand.vmem [shape: bf16[8,32], index: 1, kind: input, shape index: {}]   ;;  %s316_s2 = inlined_call_operand.vmem [shape: f32[1,32], index: 2, kind: input, shape index: {}]   ;;  %s317_s3 = inlined_call_operand.vmem [shape: f32[2,6,32], index: 3, kind: output, shape index: {}]  }
   0x1 LB: > { %s250_s13 = sadd.s32 4294967295, %s275_s12   ;;  %p254_p0 = scmp.ge.s32.totalorder %s275_s12, 1  ;;  %s275_s12 = sphi %s297_s12, %s13_s12  }
   0x2   : > { %p136_p1 = scmp.lt.s32.totalorder %s275_s12, 3 }
   0x4   : > { %p137_p2 = pnand %p254_p0, %p136_p1 }
   0x5   : > { %p158_p3 = scmp.lt.s32.totalorder (!%p137_p2), %s250_s13, 1 }
   0x6   : > { %140 = sbr.rel (%p137_p2) target bundleno = 151 (0x97), region = 32 }
   0xb   : > { %v169_v0 = vld [vmem:[%s315_s1] sm:$0xf]  ;;  %vm178_vm0 = vcmask 1043456   ;;  %s319_s13 = smov (!%p158_p3, %s250_s13), 1  ;;  %vm174_vm1 = vcmask 64512   ;;  %vm195_vm2 = vcmask 259072  }
   0xc   : > { %v180_v1 = vsel %vm178_vm0, %v169_v0, 0  ;;  %s255_s16 = sshll.u32 %s319_s13, 3  ;;  %v268_v4 = vld [vmem:[%s316_s2] ss:$0 sm:$0xff] }
   0xd   : > { %189 = vmatpush.bf16.msra.mxu0 %v180_v1  ;;  %s161_s19 = scalar_lea.vmem %s314_s0, %s255_s16  ;;  %s165_s24 = scalar_lea.vmem %s317_s3, %s255_s16 }
   0xe   : > { %v167_v2 = vld [vmem:[%s161_s19] sm:$0x3f] }
   0xf   : > { %v168_v3 = vpack.c.bf16 %v167_v2, %v167_v2 }
  0x11   : > { %257 = vmatmul.msk.bf16.vlgmr.msra.gmra.mxu0 %vm174_vm1, %v168_v3 }
  0x8e   : > { %v191_v5 = vpop.f32.mrf.mxu0 }
  0x8f   : > { %v192_v6 = vadd.f32 %v268_v4, %v191_v5 }
  0x91   : > { %196 = vst.msk [vmem:[%s165_s24] sm:$0x3f] %vm195_vm2, %v192_v6 }
  0x96   : > { %v193_v7 = vpop.f32.mrf.mxu0 }
  0x97 PF: > { %s13_s12 = sadd.s32 1, %s275_s12  }
  0x98   : > { %p10_p4 = scmp.ge.s32.totalorder %s13_s12, 4  }
  0x9a   :  { %12 = sbr.rel (!%p10_p4) target bundleno = 1 (0x1), region = 62 }

// kernel: itransformer_forward.5
= control target key start
LH: loop header
LB: loop body
LE: loop exit
PB: predicated region body
PF: predicated region fallthrough
CT: control target
= control target key end

     0   :  { %s1926_s24 = smov 0   ;;  %s2181_s0 = inlined_call_operand.vmem [shape: f32[2,6,32], index: 0, kind: input, shape index: {}]   ;;  %s2182_s1 = inlined_call_operand.vmem [shape: bf16[4,32,8], index: 1, kind: input, shape index: {}]   ;;  %s2183_s2 = inlined_call_operand.vmem [shape: f32[4,1,8], index: 2, kind: input, shape index: {}]   ;;  %s2184_s3 = inlined_call_operand.vmem [shape: bf16[4,32,8], index: 3, kind: input, shape index: {}]   ;;  %s2185_s4 = inlined_call_operand.vmem [shape: f32[4,1,8], index: 4, kind: input, shape index: {}]   ;;  %s2186_s5 = inlined_call_operand.vmem [shape: bf16[4,32,8], index: 5, kind: input, shape index: {}]   ;;  %s2187_s6 = inlined_call_operand.vmem [shape: f32[4,1,8], index: 6, kind: input, shape index: {}]   ;;  %s2188_s7 = inlined_call_operand.vmem [shape: bf16[4,8,32], index: 7, kind: input, shape index: {}]   ;;  %s2189_s8 = inlined_call_operand.vmem [shape: f32[1,32], index: 8, kind: input, shape index: {}]   ;;  %s2190_s9 = inlined_call_operand.vmem [shape: f32[1,32], index: 9, kind: input, shape index: {}]   ;;  %s2191_s10 = inlined_call_operand.vmem [shape: f32[1,32], index: 10, kind: input, shape index: {}]   ;;  %s2192_s11 = inlined_call_operand.vmem [shape: bf16[32,64], index: 11, kind: input, shape index: {}]   ;;  %s2193_s12 = inlined_call_operand.vmem [shape: f32[1,64], index: 12, kind: input, shape index: {}]   ;;  %s2194_s13 = inlined_call_operand.vmem [shape: bf16[64,32], index: 13, kind: input, shape index: {}]   ;;  %s2195_s14 = inlined_call_operand.vmem [shape: f32[1,32], index: 14, kind: input, shape index: {}]   ;;  %s2196_s15 = inlined_call_operand.vmem [shape: f32[1,32], index: 15, kind: input, shape index: {}]   ;;  %s2197_s16 = inlined_call_operand.vmem [shape: f32[1,32], index: 16, kind: input, shape index: {}]   ;;  %s2198_s17 = inlined_call_operand.vmem [shape: f32[2,6,32], index: 17, kind: output, shape index: {}]  }
   0x1   :  { %2200 = sst [smem:[#allocation2_spill]] %s2181_s0 }
   0x2   :  { %2201 = sst [smem:[#allocation3_spill]] %s2182_s1 }
   0x3 LB: > { %s1536_s25 = sadd.s32 4294967295, %s1833_s24   ;;  %p1540_p0 = scmp.ge.s32.totalorder %s1833_s24, 1  ;;  %s1833_s24 = sphi %s1926_s24, %s27_s24  }
   0x4   : > { %p486_p1 = scmp.lt.s32.totalorder %s1833_s24, 3 }
   0x6   : > { %p487_p2 = pnand %p1540_p0, %p486_p1 }
   0x7   : > { %s2202_s28 = sld [smem:[#allocation3_spill]] (!%p487_p2)  ;;  %p536_p3 = scmp.lt.s32.totalorder (!%p487_p2), %s1536_s25, 1 }
   0x8   : > { %490 = sbr.rel (%p487_p2) target bundleno = 3189 (0xc75), region = 88  ;;  %s2203_s23 = sld [smem:[#allocation2_spill]] (!%p487_p2) }
   0xd   : > { %v1748_v0 = vld [vmem:[%s2202_s28 + $0x8] sm:$0xff]  ;;  %v1747_v2 = vld [vmem:[%s2202_s28] sm:$0xff]  ;;  %s2205_s25 = smov (!%p536_p3, %s1536_s25), 1  ;;  %vm567_vm0 = vcmask 261120   ;;  %vm650_vm1 = vcmask 64512   ;;  %vm677_vm2 = vcmask 46080  }
   0xe   : > { %v1750_v1 = vld [vmem:[%s2184_s3 + $0x8] sm:$0xff]  ;;  %577 = vmatpush.bf16.msra.mxu0 %v1748_v0  ;;  %v1749_v3 = vld [vmem:[%s2184_s3] sm:$0xff]  ;;  %s1541_s20 = sshll.u32 %s2205_s25, 3  ;;  %v1756_v27 = vld [vmem:[%s2184_s3 + $0x18] sm:$0xff]  ;;  %vm693_vm3 = vcmask 1045504   ;;  %vm689_vm4 = vcmask 48128  }
   0xf   : > { %610 = vmatpush.bf16.msra.mxu1 %v1750_v1  ;;  %s539_s26 = scalar_lea.vmem %s2203_s23, %s1541_s20  ;;  %v1787_v6 = vld [vmem:[%s2185_s4] ss:$0 sm:$0xff]  ;;  %v1752_v14 = vld [vmem:[%s2186_s5 + $0x8] sm:$0xff]  ;;  %v1755_v28 = vld [vmem:[%s2184_s3 + $0x10] sm:$0xff]  ;;  %vm893_vm5 = vcmask 1043456   ;;  %vm1319_vm6 = vcmask 259072   ;;  %s543_s29 = scalar_lea.vmem %s2198_s17, %s1541_s20 }
  0x10   : > { %v1954_v4 = vld [vmem:[%s539_s26] sm:$0x3f]  ;;  %643 = vmatpush.bf16.msra.mxu2 %v1752_v14  ;;  %v1754_v29 = vld [vmem:[%s2202_s28 + $0x18] sm:$0xff]  ;;  %v1753_v30 = vld [vmem:[%s2202_s28 + $0x10] sm:$0xff]  ;;  %vm1432_vm11 = vcmask 523264  }
  0x11   : > { %v1958_v5 = vpack.c.bf16 %v1954_v4, %v1954_v4  ;;  %v1786_v7 = vld [vmem:[%s2183_s2] ss:$0 sm:$0xff]  ;;  %v1789_v34 = vld [vmem:[%s2185_s4 + $0x1] ss:$0 sm:$0xff]  ;;  %v1758_v46 = vld [vmem:[%s2186_s5 + $0x18] sm:$0xff] }
  0x12   : > { %578 = vmatpush.bf16.msra.mxu0 %v1747_v2  ;;  %v1751_v15 = vld [vmem:[%s2186_s5] sm:$0xff]  ;;  %v1757_v47 = vld [vmem:[%s2186_s5 + $0x10] sm:$0xff]  ;;  %v1762_v61 = vld [vmem:[%s2184_s3 + $0x28] sm:$0xff] }
  0x13   : > { %611 = vmatpush.bf16.msra.mxu1 %v1749_v3  ;;  %v1788_v25 = vld [vmem:[%s2187_s6] ss:$0 sm:$0xff]  ;;  %v1790_v42 = vld [vmem:[%s2183_s2 + $0x1] ss:$0 sm:$0xff]  ;;  %v1760_v62 = vld [vmem:[%s2202_s28 + $0x28] sm:$0xff] }
  0x14   : > { %644 = vmatpush.bf16.msra.mxu2 %v1751_v15  ;;  %v718_v37 = vld [vmem:[%s2188_s7] sm:$0xf] }
  0x15   : > { %1551 = vmatmul.msk.bf16.vlgmr.msra.gmra.mxu0 %vm567_vm0, %v1958_v5  ;;  %v914_v38 = vsel %vm893_vm5, %v718_v37, 0  ;;  %v1791_v52 = vld [vmem:[%s2187_s6 + $0x1] ss:$0 sm:$0xff] }
  0x16   : > { %1560 = vmatmul.msk.bf16.vlgmr.msra.gmra.mxu1 %vm567_vm0, %v1958_v5  ;;  %v1761_v63 = vld [vmem:[%s2184_s3 + $0x20] sm:$0xff] }
  0x17   : > { %1569 = vmatmul.msk.bf16.vlgmr.msra.gmra.mxu2 %vm567_vm0, %v1958_v5  ;;  %817 = vmatpush.bf16.msrb.mxu1 %v1758_v46  ;;  %v1759_v0 = vld [vmem:[%s2202_s28 + $0x20] sm:$0xff] }
  0x18   : > { %v1795_v46 = vld [vmem:[%s2185_s4 + $0x3] ss:$0 sm:$0xff] }
  0x1b   : > { %818 = vmatpush.bf16.msrb.mxu1 %v1757_v47 }
  0x1f   : > { %957 = vmatpush.bf16.msra.mxu1 %v1760_v62 }
  0x23   : > { %958 = vmatpush.bf16.msra.mxu1 %v1759_v0 }
  0x26   : > { %1615 = vmatmul.msk.bf16.vlgmr.msrb.gmra.mxu1 %vm567_vm0, %v1958_v5 }
  0x36   : > { %1636 = vmatmul.msk.bf16.vlgmr.msra.gmra.mxu1 %vm567_vm0, %v1958_v5 }
  0x92   : > { %v580_v8 = vpop.f32.mrf.mxu0 }
  0x93   : > { %v613_v9 = vpop.f32.mrf.mxu1  ;;  %v581_v11 = vadd.f32 %v1786_v7, %v580_v8 }
  0x94   : > { %v614_v10 = vadd.f32 %v1787_v6, %v613_v9  ;;  %v1620_v6 = vld [vmem:[%s2188_s7 + $0x4] sm:$0xf] }
  0x95   : > { %v895_v7 = vsel %vm893_vm5, %v1620_v6, 0 }
  0x96   : > { %1570 = vmatpush.xpose.msk.msrb.mxu0 %vm650_vm1, %v614_v10 }
  0x99   : > { %1571 = vmatmul.msk.f32.vlgmr.msrb.gmra.mxu0 %vm650_vm1, %v581_v11 }
  0x9a   : > { %v582_v12 = vpop.f32.mrf.mxu0  ;;  %v646_v18 = vpop.f32.mrf.mxu2  ;;  %782 = vmatpush.bf16.msra.mxu0 %v1756_v27 }
  0x9b   : > { %v615_v13 = vpop.f32.mrf.mxu1  ;;  %v647_v26 = vadd.f32 %v1788_v25, %v646_v18  ;;  %v1793_v12 = vld [vmem:[%s2185_s4 + $0x2] ss:$0 sm:$0xff]  ;;  %v1764_v18 = vld [vmem:[%s2186_s5 + $0x28] sm:$0xff] }
  0x9c   : > { %v1792_v13 = vld [vmem:[%s2183_s2 + $0x2] ss:$0 sm:$0xff] }
  0x9d   : > { %1572 = vmatpush.msk.msra.mxu3 %vm693_vm3, %v647_v26 }
  0x9e   : > { %783 = vmatpush.bf16.msra.mxu0 %v1755_v28 }
  0x9f   : > { %747 = vmatpush.bf16.msrb.mxu3 %v1754_v29 }
  0xa1   : > { %1601 = vmatmul.msk.bf16.vlgmr.msra.gmra.mxu0 %vm567_vm0, %v1958_v5 }
  0xa2   : > { %v648_v21 = vpop.f32.mrf.mxu2  ;;  %923 = vmatpush.bf16.msrb.mxu0 %v914_v38 }
  0xa3   : > { %748 = vmatpush.bf16.msrb.mxu3 %v1753_v30  ;;  %v820_v53 = vpop.f32.mrf.mxu1 }
  0xa4   : > { %v821_v54 = vadd.f32 %v1791_v52, %v820_v53  ;;  %v1770_v53 = vld [vmem:[%s2186_s5 + $0x38] sm:$0xff] }
  0xab   : > { %v822_v55 = vpop.f32.mrf.mxu1 }
  0xb3   : > { %v960_v8 = vpop.f32.mrf.mxu1 }
  0xbb   : > { %v962_v9 = vpop.f32.mrf.mxu1 }
  0xbc   : > { %v1717_v9 = vld [vmem:[%s2188_s7 + $0xc] sm:$0xf] }
 0x116   : > { %v674_v16 = vpop.f32.mrf.mxu0 }
 0x117   : > { %v678_v17 = vsel %vm677_vm2, %v674_v16, -inf }
 0x118   : > { %679 = vmax.xlane.f32.xlu0 %v678_v17 }
 0x11e   : > { %v785_v35 = vpop.f32.mrf.mxu0 }
 0x11f   : > { %v786_v36 = vadd.f32 %v1789_v34, %v785_v35  ;;  %v1766_v34 = vld [vmem:[%s2202_s28 + $0x38] sm:$0xff]  ;;  %v1767_v35 = vld [vmem:[%s2184_s3 + $0x30] sm:$0xff] }
 0x121   : > { %1616 = vmatpush.xpose.msk.msrb.mxu2 %vm650_vm1, %v786_v36  ;;  %v1765_v36 = vld [vmem:[%s2202_s28 + $0x30] sm:$0xff] }
 0x125   : > { %1618 = vmatpush.msk.msra.mxu2 %vm693_vm3, %v821_v54  ;;  %v1769_v54 = vld [vmem:[%s2186_s5 + $0x30] sm:$0xff] }
 0x126   : > { %v787_v39 = vpop.f32.mrf.mxu0 }
 0x18b   : > { %v680_v19 = vpop.xlane.xlu0 %679 }
 0x18c   : > { %v681_v20 = vsub.f32 %v674_v16, %v680_v19  ;;  %v961_v16 = vadd.f32 %v1792_v13, %v960_v8  ;;  %v1763_v19 = vld [vmem:[%s2186_s5 + $0x20] sm:$0xff] }
 0x18d   : > { %v1798_v13 = vld [vmem:[%s2189_s8] ss:$0 sm:$0xff] }
 0x18e   : > { %v682_v22 = vmul.f32 1.442695, %v681_v20 }
 0x190   : > { %1805 = vpow2.f32 %v682_v22 }
 0x196   : > { %v1806_v23 = vpop.eup %1805 }
 0x197   : > { %v684_v24 = vsel %vm677_vm2, %v1806_v23, 0.0 }
 0x198   : > { %685 = vadd.xlane.f32.xlu0 %v684_v24  ;;  %v1794_v24 = vld [vmem:[%s2187_s6 + $0x2] ss:$0 sm:$0xff] }
 0x20b   : > { %v686_v31 = vpop.xlane.xlu0 %685 }
 0x20c   : > { %1807 = vrcp.f32 %v686_v31 }
 0x212   : > { %v1808_v32 = vpop.eup %1807 }
 0x213   : > { %v688_v33 = vmul.f32 %v1808_v32, %v1806_v23 }
 0x215   : > { %1573 = vmatmul.msk.f32.vlgmr.msra.gmra.mxu3 %vm689_vm4, %v688_v33  ;;  %v1768_v33 = vld [vmem:[%s2184_s3 + $0x38] sm:$0xff] }
 0x216   : > { %904 = vmatpush.bf16.msra.mxu3 %v895_v7 }
 0x21d   : > { %1587 = vmatmul.msk.bf16.vlgmr.msrb.gmra.mxu3 %vm567_vm0, %v1958_v5 }
 0x21e   : > { %1027 = vmatpush.bf16.msrb.mxu3 %v1764_v18 }
 0x222   : > { %1028 = vmatpush.bf16.msrb.mxu3 %v1763_v19 }
 0x298   : > { %v714_v40 = vpop.f32.mrf.mxu3 }
 0x299   : > { %v717_v41 = vpack.c.bf16 %v714_v40, %v714_v40  ;;  %v1669_v40 = vld [vmem:[%s2188_s7 + $0x8] sm:$0xf] }
 0x29b   : > { %1622 = vmatmul.msk.bf16.vlgmr.msrb.gmra.mxu0 %vm650_vm1, %v717_v41  ;;  %v1104_v41 = vsel %vm893_vm5, %v1669_v40, 0 }
 0x2a0   : > { %v750_v43 = vpop.f32.mrf.mxu3 }
 0x2a1   : > { %v751_v44 = vadd.f32 %v1790_v42, %v750_v43 }
 0x2a3   : > { %1617 = vmatmul.msk.f32.vlgmr.msrb.gmra.mxu2 %vm650_vm1, %v751_v44 }
 0x2a4   : > { %992 = vmatpush.bf16.msrb.mxu2 %v1762_v61  ;;  %v1797_v61 = vld [vmem:[%s2187_s6 + $0x3] ss:$0 sm:$0xff] }
 0x2a8   : > { %v752_v45 = vpop.f32.mrf.mxu3  ;;  %993 = vmatpush.bf16.msrb.mxu2 %v1761_v63 }
 0x318   : > { %v2024_v48 = vpop.f32.mrf.mxu0 }
 0x320   : > { %v927_v49 = vpop.f32.mrf.mxu0 }
 0x326   : > { %v847_v50 = vpop.f32.mrf.mxu2 }
 0x327   : > { %v850_v51 = vsel %vm677_vm2, %v847_v50, -inf }
 0x328   : > { %851 = vmax.xlane.f32.xlu1 %v850_v51 }
 0x39b   : > { %v852_v56 = vpop.xlane.xlu1 %851 }
 0x39c   : > { %v853_v57 = vsub.f32 %v847_v50, %v852_v56  ;;  %v1796_v50 = vld [vmem:[%s2183_s2 + $0x3] ss:$0 sm:$0xff] }
 0x39e   : > { %v854_v58 = vmul.f32 1.442695, %v853_v57 }
 0x3a0   : > { %1809 = vpow2.f32 %v854_v58 }
 0x3a6   : > { %v1810_v59 = vpop.eup %1809 }
 0x3a7   : > { %v856_v60 = vsel %vm677_vm2, %v1810_v59, 0.0 }
 0x3a8   : > { %857 = vadd.xlane.f32.xlu1 %v856_v60 }
 0x41b   : > { %v858_v1 = vpop.xlane.xlu1 %857 }
 0x41c   : > { %1811 = vrcp.f32 %v858_v1 }
 0x422   : > { %v1812_v2 = vpop.eup %1811 }
 0x423   : > { %v860_v3 = vmul.f32 %v1812_v2, %v1810_v59 }
 0x425   : > { %1619 = vmatmul.msk.f32.vlgmr.msra.gmra.mxu2 %vm689_vm4, %v860_v3 }
 0x426   : > { %1113 = vmatpush.bf16.msra.mxu2 %v1104_v41 }
 0x42d   : > { %1650 = vmatmul.msk.bf16.vlgmr.msrb.gmra.mxu2 %vm567_vm0, %v1958_v5 }
 0x4a8   : > { %v884_v10 = vpop.f32.mrf.mxu2 }
 0x4a9   : > { %v887_v11 = vpack.c.bf16 %v884_v10, %v884_v10  ;;  %v1295_v10 = vsel %vm893_vm5, %v1717_v9, 0 }
 0x4ab   : > { %1621 = vmatmul.msk.bf16.vlgmr.msra.gmra.mxu3 %vm650_vm1, %v887_v11 }
 0x4ac   : > { %1218 = vmatpush.bf16.msra.mxu3 %v1770_v53  ;;  %v1773_v53 = vld [vmem:[%s2194_s13] sm:$0xff] }
 0x4b0   : > { %v995_v14 = vpop.f32.mrf.mxu2  ;;  %1219 = vmatpush.bf16.msra.mxu3 %v1769_v54  ;;  %v1801_v54 = vld [vmem:[%s2193_s12] ss:$0 sm:$0xff] }
 0x4b1   : > { %v996_v15 = vadd.f32 %v1793_v12, %v995_v14 }
 0x4b3   : > { %1665 = vmatpush.xpose.msk.msra.mxu0 %vm650_vm1, %v996_v15 }
 0x4b6   : > { %1666 = vmatmul.msk.f32.vlgmr.msra.gmra.mxu0 %vm650_vm1, %v961_v16 }
 0x4b7   : > { %1148 = vmatpush.bf16.msrb.mxu0 %v1766_v34 }
 0x4b8   : > { %v997_v17 = vpop.f32.mrf.mxu2 }
 0x4bb   : > { %1664 = vmatmul.msk.bf16.vlgmr.msrb.gmra.mxu3 %vm567_vm0, %v1958_v5  ;;  %1149 = vmatpush.bf16.msrb.mxu0 %v1765_v36  ;;  %v1775_v36 = vld [vmem:[%s2194_s13 + $0x10] sm:$0xff] }
 0x4be   : > { %1684 = vmatmul.msk.bf16.vlgmr.msrb.gmra.mxu0 %vm567_vm0, %v1958_v5 }
 0x4cb   : > { %1712 = vmatmul.msk.bf16.vlgmr.msra.gmra.mxu3 %vm567_vm0, %v1958_v5 }
 0x52e   : > { %v906_v20 = vpop.f32.mrf.mxu3 }
 0x52f   : > { %v926_v55 = vadd.f32 %v2024_v48, %v906_v20  ;;  %v1835_v20 = vmov 32.0  }
 0x533   : > { %v1057_v21 = vpop.f32.mrf.mxu0 }
 0x534   : > { %v1060_v22 = vsel %vm677_vm2, %v1057_v21, -inf }
 0x535   : > { %1061 = vmax.xlane.f32.xlu2 %v1060_v22 }
 0x536   : > { %v908_v23 = vpop.f32.mrf.mxu3 }
 0x53b   : > { %v1151_v42 = vpop.f32.mrf.mxu0 }
 0x53c   : > { %v1152_v51 = vadd.f32 %v1796_v50, %v1151_v42 }
 0x53e   : > { %v1030_v25 = vpop.f32.mrf.mxu3 }
 0x53f   : > { %v1031_v26 = vadd.f32 %v1794_v24, %v1030_v25 }
 0x541   : > { %1667 = vmatpush.msk.msrb.mxu1 %vm693_vm3, %v1031_v26 }
 0x543   : > { %1183 = vmatpush.bf16.msra.mxu1 %v1768_v33  ;;  %v1153_v43 = vpop.f32.mrf.mxu0  ;;  %v1776_v33 = vld [vmem:[%s2194_s13 + $0x18] sm:$0xff] }
 0x544   : > { %1440 = vmatpush.bf16.msrb.mxu3 %v1776_v33 }
 0x546   : > { %v1032_v29 = vpop.f32.mrf.mxu3 }
 0x547   : > { %1184 = vmatpush.bf16.msra.mxu1 %v1767_v35 }
 0x548   : > { %1441 = vmatpush.bf16.msrb.mxu3 %v1775_v36 }
 0x54e   : > { %v1221_v62 = vpop.f32.mrf.mxu3 }
 0x54f   : > { %v1222_v63 = vadd.f32 %v1797_v61, %v1221_v62 }
 0x551   : > { %1715 = vmatpush.msk.msra.mxu0 %vm693_vm3, %v1222_v63 }
 0x5a8   : > { %v1062_v27 = vpop.xlane.xlu2 %1061 }
 0x5a9   : > { %v1063_v28 = vsub.f32 %v1057_v21, %v1062_v27 }
 0x5ab   : > { %v1064_v30 = vmul.f32 1.442695, %v1063_v28 }
 0x5ad   : > { %1813 = vpow2.f32 %v1064_v30 }
 0x5b3   : > { %v1814_v31 = vpop.eup %1813 }
 0x5b4   : > { %v1066_v32 = vsel %vm677_vm2, %v1814_v31, 0.0 }
 0x5b5   : > { %1067 = vadd.xlane.f32.xlu2 %v1066_v32  ;;  %v1771_v32 = vld [vmem:[%s2192_s11] sm:$0xff] }
 0x628   : > { %v1068_v37 = vpop.xlane.xlu2 %1067 }
 0x629   : > { %1815 = vrcp.f32 %v1068_v37 }
 0x62f   : > { %v1816_v38 = vpop.eup %1815 }
 0x630   : > { %v1070_v39 = vmul.f32 %v1816_v38, %v1814_v31 }
 0x632   : > { %1668 = vmatmul.msk.f32.vlgmr.msrb.gmra.mxu1 %vm689_vm4, %v1070_v39 }
 0x633   : > { %1304 = vmatpush.bf16.msrb.mxu1 %v1295_v10 }
 0x63a   : > { %1698 = vmatmul.msk.bf16.vlgmr.msra.gmra.mxu1 %vm567_vm0, %v1958_v5  ;;  %v1223_v5 = vpop.f32.mrf.mxu3 }
 0x6af   : > { %v1094_v44 = vpop.f32.mrf.mxu1 }
 0x6b0   : > { %v1097_v45 = vpack.c.bf16 %v1094_v44, %v1094_v44  ;;  %v1799_v44 = vld [vmem:[%s2190_s9] ss:$0 sm:$0xff] }
 0x6b2   : > { %1670 = vmatmul.msk.bf16.vlgmr.msra.gmra.mxu2 %vm650_vm1, %v1097_v45 }
 0x6b7   : > { %v1186_v47 = vpop.f32.mrf.mxu1 }
 0x6b8   : > { %v1187_v49 = vadd.f32 %v1795_v46, %v1186_v47  ;;  %v1800_v46 = vld [vmem:[%s2191_s10] ss:$0 sm:$0xff] }
 0x6ba   : > { %1713 = vmatpush.xpose.msk.msrb.mxu2 %vm650_vm1, %v1187_v49 }
 0x6bf   : > { %v1188_v52 = vpop.f32.mrf.mxu1 }
 0x6c0   : > { %v1774_v52 = vld [vmem:[%s2194_s13 + $0x8] sm:$0xff] }
 0x6c1   : > { %1442 = vmatpush.bf16.msrb.mxu3 %v1774_v52 }
 0x6c2   : > { %1714 = vmatmul.msk.f32.vlgmr.msrb.gmra.mxu2 %vm650_vm1, %v1152_v51 }
 0x6c5   : > { %1443 = vmatpush.bf16.msrb.mxu3 %v1773_v53 }
 0x735   : > { %v1115_v56 = vpop.f32.mrf.mxu2 }
 0x736   : > { %v1119_v57 = vadd.f32 %v1115_v56, %v926_v55 }
 0x73d   : > { %v1117_v58 = vpop.f32.mrf.mxu2 }
 0x745   : > { %v1248_v59 = vpop.f32.mrf.mxu2 }
 0x746   : > { %v1251_v60 = vsel %vm677_vm2, %v1248_v59, -inf }
 0x747   : > { %1252 = vmax.xlane.f32.xlu0 %v1251_v60  ;;  %v1802_v60 = vld [vmem:[%s2195_s14] ss:$0 sm:$0xff] }
 0x7ba   : > { %v1253_v0 = vpop.xlane.xlu0 %1252 }
 0x7bb   : > { %v1254_v1 = vsub.f32 %v1248_v59, %v1253_v0 }
 0x7bd   : > { %v1255_v2 = vmul.f32 1.442695, %v1254_v1 }
 0x7bf   : > { %1817 = vpow2.f32 %v1255_v2 }
 0x7c5   : > { %v1818_v48 = vpop.eup %1817 }
 0x7c6   : > { %v1257_v3 = vsel %vm677_vm2, %v1818_v48, 0.0 }
 0x7c7   : > { %1258 = vadd.xlane.f32.xlu1 %v1257_v3 }
 0x83a   : > { %v1259_v6 = vpop.xlane.xlu1 %1258 }
 0x83b   : > { %1819 = vrcp.f32 %v1259_v6 }
 0x83c   : > { %1821 = vrcp.f32 %v1835_v20 }
 0x841   : > { %v1820_v7 = vpop.eup %1819 }
 0x842   : > { %v1261_v8 = vmul.f32 %v1820_v7, %v1818_v48  ;;  %v1822_v21 = vpop.eup %1821 }
 0x843   : > { %v1324_v22 = vmul.f32 32.0, %v1822_v21  ;;  %vm1328_vm7 = vweird.f32 %v1822_v21 }
 0x844   : > { %1716 = vmatmul.msk.f32.vlgmr.msra.gmra.mxu0 %vm689_vm4, %v1261_v8 }
 0x845   : > { %v1325_v23 = vsub.f32 1.0, %v1324_v22 }
 0x847   : > { %v1326_v24 = vmul.f32 %v1822_v21, %v1325_v23 }
 0x849   : > { %v1327_v25 = vadd.f32 %v1822_v21, %v1326_v24 }
 0x84b   : > { %v1329_v26 = vsel %vm1328_vm7, %v1822_v21, %v1327_v25 }
 0x8c1   : > { %v1285_v11 = vpop.f32.mrf.mxu0 }
 0x8c2   : > { %v1288_v12 = vpack.c.bf16 %v1285_v11, %v1285_v11 }
 0x8c4   : > { %1718 = vmatmul.msk.bf16.vlgmr.msrb.gmra.mxu1 %vm650_vm1, %v1288_v12 }
 0x941   : > { %v1306_v14 = vpop.f32.mrf.mxu1 }
 0x942   : > { %v1310_v15 = vadd.f32 %v1306_v14, %v1119_v57 }
 0x944   : > { %v1315_v16 = vadd.f32 %v1798_v13, %v1310_v15 }
 0x946   : > { %v1316_v17 = vadd.f32 %v1315_v16, %v1954_v4  ;;  %v1772_v4 = vld [vmem:[%s2192_s11 + $0x8] sm:$0xff]  ;;  %v1803_v16 = vld [vmem:[%s2196_s15] ss:$0 sm:$0xff] }
 0x947   : > { %1387 = vmatpush.bf16.msra.mxu2 %v1772_v4 }
 0x948   : > { %v1320_v18 = vsel %vm1319_vm6, %v1316_v17, 0.0 }
 0x949   : > { %v1308_v19 = vpop.f32.mrf.mxu1  ;;  %1321 = vadd.xlane.f32.xlu2 %v1320_v18  ;;  %v1804_v18 = vld [vmem:[%s2197_s16] ss:$0 sm:$0xff] }
 0x94b   : > { %1388 = vmatpush.bf16.msra.mxu2 %v1771_v32 }
 0x9bc   : > { %v1322_v27 = vpop.xlane.xlu2 %1321 }
 0x9bd   : > { %v1330_v28 = vmul.f32 %v1329_v26, %v1322_v27 }
 0x9bf   : > { %v1331_v29 = vsub.f32 %v1316_v17, %v1330_v28 }
 0x9c1   : > { %v1332_v30 = vmul.f32 %v1331_v29, %v1331_v29 }
 0x9c3   : > { %v1333_v31 = vsel %vm1319_vm6, %v1332_v30, 0.0 }
 0x9c4   : > { %1334 = vadd.xlane.f32.xlu0 %v1333_v31 }
 0xa37   : > { %v1335_v34 = vpop.xlane.xlu0 %1334 }
 0xa38   : > { %v1336_v35 = vmul.f32 %v1335_v34, %v1329_v26 }
 0xa3a   : > { %v1337_v37 = vadd.f32 1e-05, %v1336_v35 }
 0xa3c   : > { %1823 = vrsqrt.f32 %v1337_v37  ;;  %vm1344_vm9 = vweird.f32 %v1337_v37 }
 0xa42   : > { %v1824_v38 = vpop.eup %1823 }
 0xa43   : > { %v1339_v39 = vmul.f32 %v1824_v38, %v1337_v37  ;;  %vm1345_vm8 = vweird.f32 %v1824_v38 }
 0xa44   : > { %vm1346_vm10 = vmor %vm1344_vm9, %vm1345_vm8 }
 0xa45   : > { %v1340_v40 = vmul.f32 %v1824_v38, %v1339_v39 }
 0xa47   : > { %v1341_v41 = vmul.f32 0.5, %v1340_v40 }
 0xa49   : > { %v1342_v42 = vsub.f32 1.5, %v1341_v41 }
 0xa4b   : > { %v1343_v43 = vmul.f32 %v1824_v38, %v1342_v42 }
 0xa4d   : > { %v1347_v45 = vsel %vm1346_vm10, %v1824_v38, %v1343_v43 }
 0xa4e   : > { %v1348_v47 = vmul.f32 %v1347_v45, %v1331_v29 }
 0xa50   : > { %v1352_v49 = vmul.f32 %v1799_v44, %v1348_v47 }
 0xa52   : > { %v1356_v50 = vadd.f32 %v1800_v46, %v1352_v49 }
 0xa54   : > { %v1357_v51 = vpack.c.bf16 %v1356_v50, %v1356_v50 }
 0xa56   : > { %1727 = vmatmul.msk.bf16.vlgmr.msra.gmra.mxu2 %vm567_vm0, %v1357_v51 }
 0xad9   : > { %v1390_v55 = vpop.f32.mrf.mxu2 }
 0xada   : > { %v1391_v56 = vadd.f32 %v1801_v54, %v1390_v55 }
 0xadc   : > { %v1394_v57 = vmax.f32 %v1391_v56, 0.0 }
 0xade   : > { %v1395_v58 = vpack.c.bf16 %v1394_v57, %v1394_v57 }
 0xae0   : > { %1744 = vmatmul.msk.bf16.vlgmr.msrb.gmra.mxu3 %vm1432_vm11, %v1395_v58 }
 0xae1   : > { %v1392_v59 = vpop.f32.mrf.mxu2 }
 0xb63   : > { %v1445_v61 = vpop.f32.mrf.mxu3 }
 0xb64   : > { %v1446_v62 = vadd.f32 %v1802_v60, %v1445_v61 }
 0xb66   : > { %v1449_v63 = vadd.f32 %v1446_v62, %v1356_v50 }
 0xb68   : > { %v1452_v0 = vsel %vm1319_vm6, %v1449_v63, 0.0 }
 0xb69   : > { %1453 = vadd.xlane.f32.xlu1 %v1452_v0 }
 0xb6b   : > { %v1447_v1 = vpop.f32.mrf.mxu3 }
 0xbdc   : > { %v1454_v5 = vpop.xlane.xlu1 %1453 }
 0xbdd   : > { %v1455_v2 = vmul.f32 %v1454_v5, %v1329_v26 }
 0xbdf   : > { %v1456_v48 = vsub.f32 %v1449_v63, %v1455_v2 }
 0xbe1   : > { %v1457_v3 = vmul.f32 %v1456_v48, %v1456_v48 }
 0xbe3   : > { %v1458_v6 = vsel %vm1319_vm6, %v1457_v3, 0.0 }
 0xbe4   : > { %1459 = vadd.xlane.f32.xlu2 %v1458_v6 }
 0xc57   : > { %v1460_v7 = vpop.xlane.xlu2 %1459 }
 0xc58   : > { %v1461_v8 = vmul.f32 %v1460_v7, %v1329_v26 }
 0xc5a   : > { %v1462_v9 = vadd.f32 1e-05, %v1461_v8 }
 0xc5c   : > { %1825 = vrsqrt.f32 %v1462_v9  ;;  %vm1469_vm13 = vweird.f32 %v1462_v9 }
 0xc62   : > { %v1826_v10 = vpop.eup %1825 }
 0xc63   : > { %v1464_v11 = vmul.f32 %v1826_v10, %v1462_v9  ;;  %vm1470_vm12 = vweird.f32 %v1826_v10 }
 0xc64   : > { %vm1471_vm14 = vmor %vm1469_vm13, %vm1470_vm12 }
 0xc65   : > { %v1465_v12 = vmul.f32 %v1826_v10, %v1464_v11 }
 0xc67   : > { %v1466_v13 = vmul.f32 0.5, %v1465_v12 }
 0xc69   : > { %v1467_v14 = vsub.f32 1.5, %v1466_v13 }
 0xc6b   : > { %v1468_v15 = vmul.f32 %v1826_v10, %v1467_v14 }
 0xc6d   : > { %v1472_v17 = vsel %vm1471_vm14, %v1826_v10, %v1468_v15 }
 0xc6e   : > { %v1473_v19 = vmul.f32 %v1472_v17, %v1456_v48 }
 0xc70   : > { %v1477_v20 = vmul.f32 %v1803_v16, %v1473_v19 }
 0xc72   : > { %v1481_v21 = vadd.f32 %v1804_v18, %v1477_v20 }
 0xc74   : > { %1482 = vst.msk [vmem:[%s543_s29] sm:$0x3f] %vm1319_vm6, %v1481_v21 }
 0xc75 PF: > { %s27_s24 = sadd.s32 1, %s1833_s24  }
 0xc76   : > { %p24_p4 = scmp.ge.s32.totalorder %s27_s24, 4  }
 0xc78   :  { %26 = sbr.rel (!%p24_p4) target bundleno = 3 (0x3), region = 139 }

</bundles_post_ra>
